<compile_context>
chip_gen: v7x
topology: tpu7x:2x2x1
jax: 0.10.0
libtpu: 0.0.40
codegen_flags: <defaults>
</compile_context>

<pallas_src>
import functools

import jax
import jax.numpy as jnp
from jax.experimental import pallas as pl
from jax.experimental.pallas import tpu as pltpu


# --------------------- fused wavefront LSTM + FC kernel -----------------------
def fused_wavefront_lstm_fc_kernel(x_ref, h0_ref, c0_ref, w_in_ref, b_in_ref,
                                   w_rec_ref, w_fc_ref, b_fc_ref, out_ref,
                                   *, num_layers, seq_len, hidden, batch_pad):
    """Whole forward pass (all LSTM layers + FC head) in one kernel body.

    Layouts (built once by the wrapper, pure plumbing):
      x_ref    : (W*Bp, Din)   time-major, batch padded to Bp, plus L-1 zero
                               tail timesteps (pipeline-drain slots).
      h0/c0    : (Bp, L*H)     per-layer states concatenated along lanes.
      w_in_ref : (Din, 4*L*H)  layer-0 input weights in the combined gate
                               column order (other layers' columns are zero).
      b_in_ref : (1, 4*L*H)    combined (b_ih + b_hh) for every layer.
      w_rec_ref: (L*H, 4*L*H)  block-structured: layer-l rows carry W_hh_l into
                               layer-l columns and W_ih_{l+1} into layer-(l+1)
                               columns (so layer>0 input projections ride the
                               same matmul).
      Gate columns are gate-major then layer: [i_0..i_{L-1}|f_*|g_*|o_*],
      each block H lanes wide, so the elementwise cell update works directly
      on the lane-concatenated (Bp, L*H) state.
    """
    L, T, H, Bp = num_layers, seq_len, hidden, batch_pad
    W = T + L - 1
    G = 4 * L * H

    # Hoisted input projection covering every wavefront step (one MXU op, off
    # the serial chain).  Tail slots (x rows = 0) reduce to the bias row.
    gx = (jnp.dot(x_ref[...], w_in_ref[...],
                  preferred_element_type=jnp.float32)
          + b_in_ref[...])                                  # (W*Bp, 4*L*H)

    w_rec = w_rec_ref[...]                                  # (L*H, 4*L*H)

    # Hoisted lane masks (JAX does not CSE broadcasts inside unrolled loops).
    gate_lane = jax.lax.broadcasted_iota(jnp.int32, (Bp, G), 1)
    g_mask = (gate_lane >= 2 * L * H) & (gate_lane < 3 * L * H)  # 'g' gate lanes
    state_lane = jax.lax.broadcasted_iota(jnp.int32, (Bp, L * H), 1)

    hcat = h0_ref[...]                                      # (Bp, L*H)
    ccat = c0_ref[...]

    # Wavefront recurrence: at step w, layer l processes timestep t = w - l.
    # Dependent chain = T + L - 1 steps instead of L * T.
    for w in range(W):
        pre = (jnp.dot(hcat, w_rec, preferred_element_type=jnp.float32)
               + gx[w * Bp:(w + 1) * Bp, :])                # (Bp, 4*L*H)

        # One sigmoid over all gate lanes; tanh(x) = 2*sigmoid(2x) - 1 on 'g'.
        z = jnp.where(g_mask, 2.0 * pre, pre)
        s = jax.nn.sigmoid(z)
        act = jnp.where(g_mask, 2.0 * s - 1.0, s)

        i_cat = act[:, 0 * L * H:1 * L * H]
        f_cat = act[:, 1 * L * H:2 * L * H]
        g_cat = act[:, 2 * L * H:3 * L * H]
        o_cat = act[:, 3 * L * H:4 * L * H]

        c_new = f_cat * ccat + i_cat * g_cat
        h_new = o_cat * jnp.tanh(c_new)

        lo = max(0, w - T + 1)            # first active layer this step
        hi = min(L - 1, w)                # last active layer this step
        if lo == 0 and hi == L - 1:       # interior step: all layers active
            hcat, ccat = h_new, c_new
        else:                             # pipeline fill/drain: masked update
            upd = (state_lane >= lo * H) & (state_lane < (hi + 1) * H)
            hcat = jnp.where(upd, h_new, hcat)
            ccat = jnp.where(upd, c_new, ccat)

    # Final Linear on the top layer's last hidden state (bias in the epilogue).
    h_top = hcat[:, (L - 1) * H: L * H]
    out_ref[...] = (jnp.dot(h_top, w_fc_ref[...],
                            preferred_element_type=jnp.float32)
                    + b_fc_ref[...])


# ------------------------------- host wrapper ----------------------------------
def lstm_model_forward(x_btd, layer_params, h0, c0, w_fc, b_fc, *, batch_pad=8):
    """x_btd: (B, T, input_size) batch_first, like the PyTorch module."""
    B, T, Din = x_btd.shape
    L = len(layer_params)
    H = h0.shape[-1]
    O = w_fc.shape[1]
    Bp = max(batch_pad, B)
    Wst = T + L - 1
    G = 4 * L * H
    f32 = jnp.float32

    # ---- wrapper-side layout plumbing (one-time, outside the kernel) ----
    # Time-major x, batch padded to a full sublane tile, plus L-1 zero tail
    # timesteps so gx[w] exists for every wavefront step (tail = bias only).
    x_tbd = jnp.transpose(x_btd, (1, 0, 2))                          # (T, B, Din)
    x_tbd = jnp.pad(x_tbd, ((0, L - 1), (0, Bp - B), (0, 0)))
    x_ext = x_tbd.reshape(Wst * Bp, Din)

    # Initial state: layers concatenated along lanes, batch padded.
    hcat0 = jnp.pad(jnp.concatenate([h0[l] for l in range(L)], axis=1),
                    ((0, Bp - B), (0, 0)))
    ccat0 = jnp.pad(jnp.concatenate([c0[l] for l in range(L)], axis=1),
                    ((0, Bp - B), (0, 0)))

    # Block-structured combined weights.  Column blocks ordered gate-major then
    # layer: [i_0..i_{L-1} | f_* | g_* | o_*], each H lanes wide.
    w_in = jnp.zeros((Din, G), f32)
    w_rec = jnp.zeros((L * H, G), f32)
    b_cat = jnp.zeros((1, G), f32)
    for l, (w_ih, w_hh, b) in enumerate(layer_params):
        for g in range(4):
            col = (g * L + l) * H
            w_rec = w_rec.at[l * H:(l + 1) * H, col:col + H].set(
                w_hh[:, g * H:(g + 1) * H])
            if l == 0:
                w_in = w_in.at[:, col:col + H].set(w_ih[:, g * H:(g + 1) * H])
            else:
                # Layer l's input is layer (l-1)'s hidden -> same matmul.
                w_rec = w_rec.at[(l - 1) * H:l * H, col:col + H].set(
                    w_ih[:, g * H:(g + 1) * H])
            b_cat = b_cat.at[:, col:col + H].set(b[:, g * H:(g + 1) * H])

    kernel = functools.partial(fused_wavefront_lstm_fc_kernel,
                               num_layers=L, seq_len=T, hidden=H, batch_pad=Bp)

    out_pad = pl.pallas_call(
        kernel,
        out_shape=jax.ShapeDtypeStruct((Bp, O), f32),
        grid=(1,),
        in_specs=[
            pl.BlockSpec((Wst * Bp, Din), lambda i: (0, 0)),   # x (time-major)
            pl.BlockSpec((Bp, L * H), lambda i: (0, 0)),       # h0 (lane-concat)
            pl.BlockSpec((Bp, L * H), lambda i: (0, 0)),       # c0
            pl.BlockSpec((Din, G), lambda i: (0, 0)),          # W_in combined
            pl.BlockSpec((1, G), lambda i: (0, 0)),            # bias combined
            pl.BlockSpec((L * H, G), lambda i: (0, 0)),        # W_rec block-struct
            pl.BlockSpec((H, O), lambda i: (0, 0)),            # W_fc^T
            pl.BlockSpec((1, O), lambda i: (0, 0)),            # b_fc
        ],
        out_specs=pl.BlockSpec((Bp, O), lambda i: (0, 0)),
        compiler_params=pltpu.CompilerParams(
            dimension_semantics=("arbitrary",)),
    )(x_ext, hcat0, ccat0, w_in, b_cat, w_rec, w_fc, b_fc)

    return out_pad[:B]


# ------------------------------ Reference (pure JAX) ---------------------------
def lstm_model_reference(x_btd, layer_params, h0, c0, w_fc, b_fc):
    layer_in = x_btd
    for l, (w_ih, w_hh, b) in enumerate(layer_params):
        H = w_hh.shape[0]

        def step(carry, x_t):
            h, c = carry
            gates = x_t @ w_ih + h @ w_hh + b[0]
            i = jax.nn.sigmoid(gates[:, 0:H])
            f = jax.nn.sigmoid(gates[:, H:2 * H])
            g = jnp.tanh(gates[:, 2 * H:3 * H])
            o = jax.nn.sigmoid(gates[:, 3 * H:4 * H])
            c = f * c + i * g
            h = o * jnp.tanh(c)
            return (h, c), h

        xs = jnp.transpose(layer_in, (1, 0, 2))
        _, hs = jax.lax.scan(step, (h0[l], c0[l]), xs)
        layer_in = jnp.transpose(hs, (1, 0, 2))
    return layer_in[:, -1, :] @ w_fc + b_fc[0]


# ---------------------------------- main ---------------------------------------
if __name__ == "__main__":
    # Small shapes consistent with the module's forward.
    B, T = 2, 8
    input_size, hidden_size, output_size, num_layers = 16, 32, 8, 2

    key = jax.random.PRNGKey(0)
    keys = iter(jax.random.split(key, 64))
    k = 1.0 / jnp.sqrt(hidden_size)

    def uniform(shape):
        return jax.random.uniform(next(keys), shape, jnp.float32, -k, k)

    # Same parameter shapes as nn.LSTM / nn.Linear, stored pre-transposed as
    # (in, 4H) / (H, O), gate column order [i|f|g|o].
    layer_params = []
    for l in range(num_layers):
        d_in = input_size if l == 0 else hidden_size
        w_ih = uniform((d_in, 4 * hidden_size))
        w_hh = uniform((hidden_size, 4 * hidden_size))
        b_ih = uniform((1, 4 * hidden_size))
        b_hh = uniform((1, 4 * hidden_size))
        layer_params.append((w_ih, w_hh, b_ih + b_hh))

    w_fc = uniform((hidden_size, output_size))
    b_fc = uniform((1, output_size))

    # Forward-pass randn initial states (the module draws these per call).
    h0 = jax.random.normal(next(keys), (num_layers, B, hidden_size), jnp.float32)
    c0 = jax.random.normal(next(keys), (num_layers, B, hidden_size), jnp.float32)

    # Input: (batch, seq, input_size) — batch_first, like the PyTorch module.
    x = jax.random.normal(next(keys), (B, T, input_size), jnp.float32)

    out = lstm_model_forward(x, layer_params, h0, c0, w_fc, b_fc)
    out = jax.block_until_ready(out)

    ref = lstm_model_reference(x, layer_params, h0, c0, w_fc, b_fc)
    assert out.shape == (B, output_size)
    assert jnp.allclose(out, ref, atol=1e-3, rtol=1e-3), (
        f"mismatch: max abs diff {jnp.max(jnp.abs(out - ref))}")

    print("KERNEL_OK")
</pallas_src>

<mosaic_0001>
module attributes {stable_mosaic.version = 11 : i64} {
  func.func @fused_wavefront_lstm_fc_kernel(%arg0: i32, %arg1: memref<72x16xf32, #tpu.memory_space<vmem>>, %arg2: memref<8x64xf32, #tpu.memory_space<vmem>>, %arg3: memref<8x64xf32, #tpu.memory_space<vmem>>, %arg4: memref<16x256xf32, #tpu.memory_space<vmem>>, %arg5: memref<1x256xf32, #tpu.memory_space<vmem>>, %arg6: memref<64x256xf32, #tpu.memory_space<vmem>>, %arg7: memref<32x8xf32, #tpu.memory_space<vmem>>, %arg8: memref<1x8xf32, #tpu.memory_space<vmem>>, %arg9: memref<8x8xf32, #tpu.memory_space<vmem>>) attributes {dimension_semantics = [#tpu.dimension_semantics<arbitrary>], iteration_bounds = array<i64: 1>, scalar_prefetch = 0 : i64, scratch_operands = 0 : i64, tpu.core_type = #tpu.core_type<tc>, window_params = [{pipeline_mode = #tpu.pipeline_mode<synchronous>, transform_indices = @transform_0, window_bounds = array<i64: 72, 16>}, {pipeline_mode = #tpu.pipeline_mode<synchronous>, transform_indices = @transform_1, window_bounds = array<i64: 8, 64>}, {pipeline_mode = #tpu.pipeline_mode<synchronous>, transform_indices = @transform_2, window_bounds = array<i64: 8, 64>}, {pipeline_mode = #tpu.pipeline_mode<synchronous>, transform_indices = @transform_3, window_bounds = array<i64: 16, 256>}, {pipeline_mode = #tpu.pipeline_mode<synchronous>, transform_indices = @transform_4, window_bounds = array<i64: 1, 256>}, {pipeline_mode = #tpu.pipeline_mode<synchronous>, transform_indices = @transform_5, window_bounds = array<i64: 64, 256>}, {pipeline_mode = #tpu.pipeline_mode<synchronous>, transform_indices = @transform_6, window_bounds = array<i64: 32, 8>}, {pipeline_mode = #tpu.pipeline_mode<synchronous>, transform_indices = @transform_7, window_bounds = array<i64: 1, 8>}, {pipeline_mode = #tpu.pipeline_mode<synchronous>, transform_indices = @transform_8, window_bounds = array<i64: 8, 8>}]} {
    %c0 = arith.constant 0 : index
    %c0_0 = arith.constant 0 : index
    %0 = vector.load %arg1[%c0, %c0_0] : memref<72x16xf32, #tpu.memory_space<vmem>>, vector<72x16xf32>
    %c0_1 = arith.constant 0 : index
    %c0_2 = arith.constant 0 : index
    %1 = vector.load %arg4[%c0_1, %c0_2] : memref<16x256xf32, #tpu.memory_space<vmem>>, vector<16x256xf32>
    %cst = arith.constant dense<0.000000e+00> : vector<72x256xf32>
    %2 = tpu.matmul %0, %1, %cst {dimension_numbers = #tpu.dot_dimension_numbers<[1], [0], [0], [1], [0, 0, 1, 1], [], []>} : vector<72x16xf32>, vector<16x256xf32>, vector<72x256xf32> -> vector<72x256xf32>
    %c0_3 = arith.constant 0 : index
    %c0_4 = arith.constant 0 : index
    %3 = vector.load %arg5[%c0_3, %c0_4] : memref<1x256xf32, #tpu.memory_space<vmem>>, vector<1x256xf32>
    %4 = vector.broadcast %3 : vector<1x256xf32> to vector<72x256xf32>
    %5 = arith.addf %2, %4 : vector<72x256xf32>
    %c0_5 = arith.constant 0 : index
    %c0_6 = arith.constant 0 : index
    %6 = vector.load %arg6[%c0_5, %c0_6] : memref<64x256xf32, #tpu.memory_space<vmem>>, vector<64x256xf32>
    %7 = tpu.iota {dimensions = array<i32: 1>} : vector<8x256xi32>
    %c128_i32 = arith.constant 128 : i32
    %8 = vector.broadcast %c128_i32 : i32 to vector<8x256xi32>
    %9 = arith.cmpi sge, %7, %8 : vector<8x256xi32>
    %c192_i32 = arith.constant 192 : i32
    %10 = vector.broadcast %c192_i32 : i32 to vector<8x256xi32>
    %11 = arith.cmpi slt, %7, %10 : vector<8x256xi32>
    %12 = arith.andi %9, %11 : vector<8x256xi1>
    %13 = tpu.iota {dimensions = array<i32: 1>} : vector<8x64xi32>
    %c0_7 = arith.constant 0 : index
    %c0_8 = arith.constant 0 : index
    %14 = vector.load %arg2[%c0_7, %c0_8] : memref<8x64xf32, #tpu.memory_space<vmem>>, vector<8x64xf32>
    %c0_9 = arith.constant 0 : index
    %c0_10 = arith.constant 0 : index
    %15 = vector.load %arg3[%c0_9, %c0_10] : memref<8x64xf32, #tpu.memory_space<vmem>>, vector<8x64xf32>
    %cst_11 = arith.constant dense<0.000000e+00> : vector<8x256xf32>
    %16 = tpu.matmul %14, %6, %cst_11 {dimension_numbers = #tpu.dot_dimension_numbers<[1], [0], [0], [1], [0, 0, 1, 1], [], []>} : vector<8x64xf32>, vector<64x256xf32>, vector<8x256xf32> -> vector<8x256xf32>
    %17 = vector.extract_strided_slice %5 {offsets = [0, 0], sizes = [8, 256], strides = [1, 1]} : vector<72x256xf32> to vector<8x256xf32>
    %18 = arith.addf %16, %17 : vector<8x256xf32>
    %cst_12 = arith.constant 2.000000e+00 : f32
    %19 = vector.broadcast %cst_12 : f32 to vector<8x256xf32>
    %20 = arith.mulf %19, %18 : vector<8x256xf32>
    %21 = arith.select %12, %20, %18 : vector<8x256xi1>, vector<8x256xf32>
    %22 = arith.negf %21 : vector<8x256xf32>
    %23 = math.exp %22 : vector<8x256xf32>
    %cst_13 = arith.constant 1.000000e+00 : f32
    %24 = vector.broadcast %cst_13 : f32 to vector<8x256xf32>
    %25 = arith.addf %24, %23 : vector<8x256xf32>
    %26 = arith.divf %24, %25 : vector<8x256xf32>
    %cst_14 = arith.constant 2.000000e+00 : f32
    %27 = vector.broadcast %cst_14 : f32 to vector<8x256xf32>
    %28 = arith.mulf %27, %26 : vector<8x256xf32>
    %cst_15 = arith.constant 1.000000e+00 : f32
    %29 = vector.broadcast %cst_15 : f32 to vector<8x256xf32>
    %30 = arith.subf %28, %29 : vector<8x256xf32>
    %31 = arith.select %12, %30, %26 : vector<8x256xi1>, vector<8x256xf32>
    %32 = vector.extract_strided_slice %31 {offsets = [0, 0], sizes = [8, 64], strides = [1, 1]} : vector<8x256xf32> to vector<8x64xf32>
    %33 = vector.extract_strided_slice %31 {offsets = [0, 64], sizes = [8, 64], strides = [1, 1]} : vector<8x256xf32> to vector<8x64xf32>
    %34 = vector.extract_strided_slice %31 {offsets = [0, 128], sizes = [8, 64], strides = [1, 1]} : vector<8x256xf32> to vector<8x64xf32>
    %35 = vector.extract_strided_slice %31 {offsets = [0, 192], sizes = [8, 64], strides = [1, 1]} : vector<8x256xf32> to vector<8x64xf32>
    %36 = arith.mulf %33, %15 : vector<8x64xf32>
    %37 = arith.mulf %32, %34 : vector<8x64xf32>
    %38 = arith.addf %36, %37 : vector<8x64xf32>
    %39 = math.tanh %38 : vector<8x64xf32>
    %40 = arith.mulf %35, %39 : vector<8x64xf32>
    %c0_i32 = arith.constant 0 : i32
    %41 = vector.broadcast %c0_i32 : i32 to vector<8x64xi32>
    %42 = arith.cmpi sge, %13, %41 : vector<8x64xi32>
    %c32_i32 = arith.constant 32 : i32
    %43 = vector.broadcast %c32_i32 : i32 to vector<8x64xi32>
    %44 = arith.cmpi slt, %13, %43 : vector<8x64xi32>
    %45 = arith.andi %42, %44 : vector<8x64xi1>
    %46 = arith.select %45, %40, %14 : vector<8x64xi1>, vector<8x64xf32>
    %47 = arith.select %45, %38, %15 : vector<8x64xi1>, vector<8x64xf32>
    %cst_16 = arith.constant dense<0.000000e+00> : vector<8x256xf32>
    %48 = tpu.matmul %46, %6, %cst_16 {dimension_numbers = #tpu.dot_dimension_numbers<[1], [0], [0], [1], [0, 0, 1, 1], [], []>} : vector<8x64xf32>, vector<64x256xf32>, vector<8x256xf32> -> vector<8x256xf32>
    %49 = vector.extract_strided_slice %5 {offsets = [8, 0], sizes = [8, 256], strides = [1, 1]} : vector<72x256xf32> to vector<8x256xf32>
    %50 = arith.addf %48, %49 : vector<8x256xf32>
    %cst_17 = arith.constant 2.000000e+00 : f32
    %51 = vector.broadcast %cst_17 : f32 to vector<8x256xf32>
    %52 = arith.mulf %51, %50 : vector<8x256xf32>
    %53 = arith.select %12, %52, %50 : vector<8x256xi1>, vector<8x256xf32>
    %54 = arith.negf %53 : vector<8x256xf32>
    %55 = math.exp %54 : vector<8x256xf32>
    %cst_18 = arith.constant 1.000000e+00 : f32
    %56 = vector.broadcast %cst_18 : f32 to vector<8x256xf32>
    %57 = arith.addf %56, %55 : vector<8x256xf32>
    %58 = arith.divf %56, %57 : vector<8x256xf32>
    %cst_19 = arith.constant 2.000000e+00 : f32
    %59 = vector.broadcast %cst_19 : f32 to vector<8x256xf32>
    %60 = arith.mulf %59, %58 : vector<8x256xf32>
    %cst_20 = arith.constant 1.000000e+00 : f32
    %61 = vector.broadcast %cst_20 : f32 to vector<8x256xf32>
    %62 = arith.subf %60, %61 : vector<8x256xf32>
    %63 = arith.select %12, %62, %58 : vector<8x256xi1>, vector<8x256xf32>
    %64 = vector.extract_strided_slice %63 {offsets = [0, 0], sizes = [8, 64], strides = [1, 1]} : vector<8x256xf32> to vector<8x64xf32>
    %65 = vector.extract_strided_slice %63 {offsets = [0, 64], sizes = [8, 64], strides = [1, 1]} : vector<8x256xf32> to vector<8x64xf32>
    %66 = vector.extract_strided_slice %63 {offsets = [0, 128], sizes = [8, 64], strides = [1, 1]} : vector<8x256xf32> to vector<8x64xf32>
    %67 = vector.extract_strided_slice %63 {offsets = [0, 192], sizes = [8, 64], strides = [1, 1]} : vector<8x256xf32> to vector<8x64xf32>
    %68 = arith.mulf %65, %47 : vector<8x64xf32>
    %69 = arith.mulf %64, %66 : vector<8x64xf32>
    %70 = arith.addf %68, %69 : vector<8x64xf32>
    %71 = math.tanh %70 : vector<8x64xf32>
    %72 = arith.mulf %67, %71 : vector<8x64xf32>
    %cst_21 = arith.constant dense<0.000000e+00> : vector<8x256xf32>
    %73 = tpu.matmul %72, %6, %cst_21 {dimension_numbers = #tpu.dot_dimension_numbers<[1], [0], [0], [1], [0, 0, 1, 1], [], []>} : vector<8x64xf32>, vector<64x256xf32>, vector<8x256xf32> -> vector<8x256xf32>
    %74 = vector.extract_strided_slice %5 {offsets = [16, 0], sizes = [8, 256], strides = [1, 1]} : vector<72x256xf32> to vector<8x256xf32>
    %75 = arith.addf %73, %74 : vector<8x256xf32>
    %cst_22 = arith.constant 2.000000e+00 : f32
    %76 = vector.broadcast %cst_22 : f32 to vector<8x256xf32>
    %77 = arith.mulf %76, %75 : vector<8x256xf32>
    %78 = arith.select %12, %77, %75 : vector<8x256xi1>, vector<8x256xf32>
    %79 = arith.negf %78 : vector<8x256xf32>
    %80 = math.exp %79 : vector<8x256xf32>
    %cst_23 = arith.constant 1.000000e+00 : f32
    %81 = vector.broadcast %cst_23 : f32 to vector<8x256xf32>
    %82 = arith.addf %81, %80 : vector<8x256xf32>
    %83 = arith.divf %81, %82 : vector<8x256xf32>
    %cst_24 = arith.constant 2.000000e+00 : f32
    %84 = vector.broadcast %cst_24 : f32 to vector<8x256xf32>
    %85 = arith.mulf %84, %83 : vector<8x256xf32>
    %cst_25 = arith.constant 1.000000e+00 : f32
    %86 = vector.broadcast %cst_25 : f32 to vector<8x256xf32>
    %87 = arith.subf %85, %86 : vector<8x256xf32>
    %88 = arith.select %12, %87, %83 : vector<8x256xi1>, vector<8x256xf32>
    %89 = vector.extract_strided_slice %88 {offsets = [0, 0], sizes = [8, 64], strides = [1, 1]} : vector<8x256xf32> to vector<8x64xf32>
    %90 = vector.extract_strided_slice %88 {offsets = [0, 64], sizes = [8, 64], strides = [1, 1]} : vector<8x256xf32> to vector<8x64xf32>
    %91 = vector.extract_strided_slice %88 {offsets = [0, 128], sizes = [8, 64], strides = [1, 1]} : vector<8x256xf32> to vector<8x64xf32>
    %92 = vector.extract_strided_slice %88 {offsets = [0, 192], sizes = [8, 64], strides = [1, 1]} : vector<8x256xf32> to vector<8x64xf32>
    %93 = arith.mulf %90, %70 : vector<8x64xf32>
    %94 = arith.mulf %89, %91 : vector<8x64xf32>
    %95 = arith.addf %93, %94 : vector<8x64xf32>
    %96 = math.tanh %95 : vector<8x64xf32>
    %97 = arith.mulf %92, %96 : vector<8x64xf32>
    %cst_26 = arith.constant dense<0.000000e+00> : vector<8x256xf32>
    %98 = tpu.matmul %97, %6, %cst_26 {dimension_numbers = #tpu.dot_dimension_numbers<[1], [0], [0], [1], [0, 0, 1, 1], [], []>} : vector<8x64xf32>, vector<64x256xf32>, vector<8x256xf32> -> vector<8x256xf32>
    %99 = vector.extract_strided_slice %5 {offsets = [24, 0], sizes = [8, 256], strides = [1, 1]} : vector<72x256xf32> to vector<8x256xf32>
    %100 = arith.addf %98, %99 : vector<8x256xf32>
    %cst_27 = arith.constant 2.000000e+00 : f32
    %101 = vector.broadcast %cst_27 : f32 to vector<8x256xf32>
    %102 = arith.mulf %101, %100 : vector<8x256xf32>
    %103 = arith.select %12, %102, %100 : vector<8x256xi1>, vector<8x256xf32>
    %104 = arith.negf %103 : vector<8x256xf32>
    %105 = math.exp %104 : vector<8x256xf32>
    %cst_28 = arith.constant 1.000000e+00 : f32
    %106 = vector.broadcast %cst_28 : f32 to vector<8x256xf32>
    %107 = arith.addf %106, %105 : vector<8x256xf32>
    %108 = arith.divf %106, %107 : vector<8x256xf32>
    %cst_29 = arith.constant 2.000000e+00 : f32
    %109 = vector.broadcast %cst_29 : f32 to vector<8x256xf32>
    %110 = arith.mulf %109, %108 : vector<8x256xf32>
    %cst_30 = arith.constant 1.000000e+00 : f32
    %111 = vector.broadcast %cst_30 : f32 to vector<8x256xf32>
    %112 = arith.subf %110, %111 : vector<8x256xf32>
    %113 = arith.select %12, %112, %108 : vector<8x256xi1>, vector<8x256xf32>
    %114 = vector.extract_strided_slice %113 {offsets = [0, 0], sizes = [8, 64], strides = [1, 1]} : vector<8x256xf32> to vector<8x64xf32>
    %115 = vector.extract_strided_slice %113 {offsets = [0, 64], sizes = [8, 64], strides = [1, 1]} : vector<8x256xf32> to vector<8x64xf32>
    %116 = vector.extract_strided_slice %113 {offsets = [0, 128], sizes = [8, 64], strides = [1, 1]} : vector<8x256xf32> to vector<8x64xf32>
    %117 = vector.extract_strided_slice %113 {offsets = [0, 192], sizes = [8, 64], strides = [1, 1]} : vector<8x256xf32> to vector<8x64xf32>
    %118 = arith.mulf %115, %95 : vector<8x64xf32>
    %119 = arith.mulf %114, %116 : vector<8x64xf32>
    %120 = arith.addf %118, %119 : vector<8x64xf32>
    %121 = math.tanh %120 : vector<8x64xf32>
    %122 = arith.mulf %117, %121 : vector<8x64xf32>
    %cst_31 = arith.constant dense<0.000000e+00> : vector<8x256xf32>
    %123 = tpu.matmul %122, %6, %cst_31 {dimension_numbers = #tpu.dot_dimension_numbers<[1], [0], [0], [1], [0, 0, 1, 1], [], []>} : vector<8x64xf32>, vector<64x256xf32>, vector<8x256xf32> -> vector<8x256xf32>
    %124 = vector.extract_strided_slice %5 {offsets = [32, 0], sizes = [8, 256], strides = [1, 1]} : vector<72x256xf32> to vector<8x256xf32>
    %125 = arith.addf %123, %124 : vector<8x256xf32>
    %cst_32 = arith.constant 2.000000e+00 : f32
    %126 = vector.broadcast %cst_32 : f32 to vector<8x256xf32>
    %127 = arith.mulf %126, %125 : vector<8x256xf32>
    %128 = arith.select %12, %127, %125 : vector<8x256xi1>, vector<8x256xf32>
    %129 = arith.negf %128 : vector<8x256xf32>
    %130 = math.exp %129 : vector<8x256xf32>
    %cst_33 = arith.constant 1.000000e+00 : f32
    %131 = vector.broadcast %cst_33 : f32 to vector<8x256xf32>
    %132 = arith.addf %131, %130 : vector<8x256xf32>
    %133 = arith.divf %131, %132 : vector<8x256xf32>
    %cst_34 = arith.constant 2.000000e+00 : f32
    %134 = vector.broadcast %cst_34 : f32 to vector<8x256xf32>
    %135 = arith.mulf %134, %133 : vector<8x256xf32>
    %cst_35 = arith.constant 1.000000e+00 : f32
    %136 = vector.broadcast %cst_35 : f32 to vector<8x256xf32>
    %137 = arith.subf %135, %136 : vector<8x256xf32>
    %138 = arith.select %12, %137, %133 : vector<8x256xi1>, vector<8x256xf32>
    %139 = vector.extract_strided_slice %138 {offsets = [0, 0], sizes = [8, 64], strides = [1, 1]} : vector<8x256xf32> to vector<8x64xf32>
    %140 = vector.extract_strided_slice %138 {offsets = [0, 64], sizes = [8, 64], strides = [1, 1]} : vector<8x256xf32> to vector<8x64xf32>
    %141 = vector.extract_strided_slice %138 {offsets = [0, 128], sizes = [8, 64], strides = [1, 1]} : vector<8x256xf32> to vector<8x64xf32>
    %142 = vector.extract_strided_slice %138 {offsets = [0, 192], sizes = [8, 64], strides = [1, 1]} : vector<8x256xf32> to vector<8x64xf32>
    %143 = arith.mulf %140, %120 : vector<8x64xf32>
    %144 = arith.mulf %139, %141 : vector<8x64xf32>
    %145 = arith.addf %143, %144 : vector<8x64xf32>
    %146 = math.tanh %145 : vector<8x64xf32>
    %147 = arith.mulf %142, %146 : vector<8x64xf32>
    %cst_36 = arith.constant dense<0.000000e+00> : vector<8x256xf32>
    %148 = tpu.matmul %147, %6, %cst_36 {dimension_numbers = #tpu.dot_dimension_numbers<[1], [0], [0], [1], [0, 0, 1, 1], [], []>} : vector<8x64xf32>, vector<64x256xf32>, vector<8x256xf32> -> vector<8x256xf32>
    %149 = vector.extract_strided_slice %5 {offsets = [40, 0], sizes = [8, 256], strides = [1, 1]} : vector<72x256xf32> to vector<8x256xf32>
    %150 = arith.addf %148, %149 : vector<8x256xf32>
    %cst_37 = arith.constant 2.000000e+00 : f32
    %151 = vector.broadcast %cst_37 : f32 to vector<8x256xf32>
    %152 = arith.mulf %151, %150 : vector<8x256xf32>
    %153 = arith.select %12, %152, %150 : vector<8x256xi1>, vector<8x256xf32>
    %154 = arith.negf %153 : vector<8x256xf32>
    %155 = math.exp %154 : vector<8x256xf32>
    %cst_38 = arith.constant 1.000000e+00 : f32
    %156 = vector.broadcast %cst_38 : f32 to vector<8x256xf32>
    %157 = arith.addf %156, %155 : vector<8x256xf32>
    %158 = arith.divf %156, %157 : vector<8x256xf32>
    %cst_39 = arith.constant 2.000000e+00 : f32
    %159 = vector.broadcast %cst_39 : f32 to vector<8x256xf32>
    %160 = arith.mulf %159, %158 : vector<8x256xf32>
    %cst_40 = arith.constant 1.000000e+00 : f32
    %161 = vector.broadcast %cst_40 : f32 to vector<8x256xf32>
    %162 = arith.subf %160, %161 : vector<8x256xf32>
    %163 = arith.select %12, %162, %158 : vector<8x256xi1>, vector<8x256xf32>
    %164 = vector.extract_strided_slice %163 {offsets = [0, 0], sizes = [8, 64], strides = [1, 1]} : vector<8x256xf32> to vector<8x64xf32>
    %165 = vector.extract_strided_slice %163 {offsets = [0, 64], sizes = [8, 64], strides = [1, 1]} : vector<8x256xf32> to vector<8x64xf32>
    %166 = vector.extract_strided_slice %163 {offsets = [0, 128], sizes = [8, 64], strides = [1, 1]} : vector<8x256xf32> to vector<8x64xf32>
    %167 = vector.extract_strided_slice %163 {offsets = [0, 192], sizes = [8, 64], strides = [1, 1]} : vector<8x256xf32> to vector<8x64xf32>
    %168 = arith.mulf %165, %145 : vector<8x64xf32>
    %169 = arith.mulf %164, %166 : vector<8x64xf32>
    %170 = arith.addf %168, %169 : vector<8x64xf32>
    %171 = math.tanh %170 : vector<8x64xf32>
    %172 = arith.mulf %167, %171 : vector<8x64xf32>
    %cst_41 = arith.constant dense<0.000000e+00> : vector<8x256xf32>
    %173 = tpu.matmul %172, %6, %cst_41 {dimension_numbers = #tpu.dot_dimension_numbers<[1], [0], [0], [1], [0, 0, 1, 1], [], []>} : vector<8x64xf32>, vector<64x256xf32>, vector<8x256xf32> -> vector<8x256xf32>
    %174 = vector.extract_strided_slice %5 {offsets = [48, 0], sizes = [8, 256], strides = [1, 1]} : vector<72x256xf32> to vector<8x256xf32>
    %175 = arith.addf %173, %174 : vector<8x256xf32>
    %cst_42 = arith.constant 2.000000e+00 : f32
    %176 = vector.broadcast %cst_42 : f32 to vector<8x256xf32>
    %177 = arith.mulf %176, %175 : vector<8x256xf32>
    %178 = arith.select %12, %177, %175 : vector<8x256xi1>, vector<8x256xf32>
    %179 = arith.negf %178 : vector<8x256xf32>
    %180 = math.exp %179 : vector<8x256xf32>
    %cst_43 = arith.constant 1.000000e+00 : f32
    %181 = vector.broadcast %cst_43 : f32 to vector<8x256xf32>
    %182 = arith.addf %181, %180 : vector<8x256xf32>
    %183 = arith.divf %181, %182 : vector<8x256xf32>
    %cst_44 = arith.constant 2.000000e+00 : f32
    %184 = vector.broadcast %cst_44 : f32 to vector<8x256xf32>
    %185 = arith.mulf %184, %183 : vector<8x256xf32>
    %cst_45 = arith.constant 1.000000e+00 : f32
    %186 = vector.broadcast %cst_45 : f32 to vector<8x256xf32>
    %187 = arith.subf %185, %186 : vector<8x256xf32>
    %188 = arith.select %12, %187, %183 : vector<8x256xi1>, vector<8x256xf32>
    %189 = vector.extract_strided_slice %188 {offsets = [0, 0], sizes = [8, 64], strides = [1, 1]} : vector<8x256xf32> to vector<8x64xf32>
    %190 = vector.extract_strided_slice %188 {offsets = [0, 64], sizes = [8, 64], strides = [1, 1]} : vector<8x256xf32> to vector<8x64xf32>
    %191 = vector.extract_strided_slice %188 {offsets = [0, 128], sizes = [8, 64], strides = [1, 1]} : vector<8x256xf32> to vector<8x64xf32>
    %192 = vector.extract_strided_slice %188 {offsets = [0, 192], sizes = [8, 64], strides = [1, 1]} : vector<8x256xf32> to vector<8x64xf32>
    %193 = arith.mulf %190, %170 : vector<8x64xf32>
    %194 = arith.mulf %189, %191 : vector<8x64xf32>
    %195 = arith.addf %193, %194 : vector<8x64xf32>
    %196 = math.tanh %195 : vector<8x64xf32>
    %197 = arith.mulf %192, %196 : vector<8x64xf32>
    %cst_46 = arith.constant dense<0.000000e+00> : vector<8x256xf32>
    %198 = tpu.matmul %197, %6, %cst_46 {dimension_numbers = #tpu.dot_dimension_numbers<[1], [0], [0], [1], [0, 0, 1, 1], [], []>} : vector<8x64xf32>, vector<64x256xf32>, vector<8x256xf32> -> vector<8x256xf32>
    %199 = vector.extract_strided_slice %5 {offsets = [56, 0], sizes = [8, 256], strides = [1, 1]} : vector<72x256xf32> to vector<8x256xf32>
    %200 = arith.addf %198, %199 : vector<8x256xf32>
    %cst_47 = arith.constant 2.000000e+00 : f32
    %201 = vector.broadcast %cst_47 : f32 to vector<8x256xf32>
    %202 = arith.mulf %201, %200 : vector<8x256xf32>
    %203 = arith.select %12, %202, %200 : vector<8x256xi1>, vector<8x256xf32>
    %204 = arith.negf %203 : vector<8x256xf32>
    %205 = math.exp %204 : vector<8x256xf32>
    %cst_48 = arith.constant 1.000000e+00 : f32
    %206 = vector.broadcast %cst_48 : f32 to vector<8x256xf32>
    %207 = arith.addf %206, %205 : vector<8x256xf32>
    %208 = arith.divf %206, %207 : vector<8x256xf32>
    %cst_49 = arith.constant 2.000000e+00 : f32
    %209 = vector.broadcast %cst_49 : f32 to vector<8x256xf32>
    %210 = arith.mulf %209, %208 : vector<8x256xf32>
    %cst_50 = arith.constant 1.000000e+00 : f32
    %211 = vector.broadcast %cst_50 : f32 to vector<8x256xf32>
    %212 = arith.subf %210, %211 : vector<8x256xf32>
    %213 = arith.select %12, %212, %208 : vector<8x256xi1>, vector<8x256xf32>
    %214 = vector.extract_strided_slice %213 {offsets = [0, 0], sizes = [8, 64], strides = [1, 1]} : vector<8x256xf32> to vector<8x64xf32>
    %215 = vector.extract_strided_slice %213 {offsets = [0, 64], sizes = [8, 64], strides = [1, 1]} : vector<8x256xf32> to vector<8x64xf32>
    %216 = vector.extract_strided_slice %213 {offsets = [0, 128], sizes = [8, 64], strides = [1, 1]} : vector<8x256xf32> to vector<8x64xf32>
    %217 = vector.extract_strided_slice %213 {offsets = [0, 192], sizes = [8, 64], strides = [1, 1]} : vector<8x256xf32> to vector<8x64xf32>
    %218 = arith.mulf %215, %195 : vector<8x64xf32>
    %219 = arith.mulf %214, %216 : vector<8x64xf32>
    %220 = arith.addf %218, %219 : vector<8x64xf32>
    %221 = math.tanh %220 : vector<8x64xf32>
    %222 = arith.mulf %217, %221 : vector<8x64xf32>
    %cst_51 = arith.constant dense<0.000000e+00> : vector<8x256xf32>
    %223 = tpu.matmul %222, %6, %cst_51 {dimension_numbers = #tpu.dot_dimension_numbers<[1], [0], [0], [1], [0, 0, 1, 1], [], []>} : vector<8x64xf32>, vector<64x256xf32>, vector<8x256xf32> -> vector<8x256xf32>
    %224 = vector.extract_strided_slice %5 {offsets = [64, 0], sizes = [8, 256], strides = [1, 1]} : vector<72x256xf32> to vector<8x256xf32>
    %225 = arith.addf %223, %224 : vector<8x256xf32>
    %cst_52 = arith.constant 2.000000e+00 : f32
    %226 = vector.broadcast %cst_52 : f32 to vector<8x256xf32>
    %227 = arith.mulf %226, %225 : vector<8x256xf32>
    %228 = arith.select %12, %227, %225 : vector<8x256xi1>, vector<8x256xf32>
    %229 = arith.negf %228 : vector<8x256xf32>
    %230 = math.exp %229 : vector<8x256xf32>
    %cst_53 = arith.constant 1.000000e+00 : f32
    %231 = vector.broadcast %cst_53 : f32 to vector<8x256xf32>
    %232 = arith.addf %231, %230 : vector<8x256xf32>
    %233 = arith.divf %231, %232 : vector<8x256xf32>
    %cst_54 = arith.constant 2.000000e+00 : f32
    %234 = vector.broadcast %cst_54 : f32 to vector<8x256xf32>
    %235 = arith.mulf %234, %233 : vector<8x256xf32>
    %cst_55 = arith.constant 1.000000e+00 : f32
    %236 = vector.broadcast %cst_55 : f32 to vector<8x256xf32>
    %237 = arith.subf %235, %236 : vector<8x256xf32>
    %238 = arith.select %12, %237, %233 : vector<8x256xi1>, vector<8x256xf32>
    %239 = vector.extract_strided_slice %238 {offsets = [0, 0], sizes = [8, 64], strides = [1, 1]} : vector<8x256xf32> to vector<8x64xf32>
    %240 = vector.extract_strided_slice %238 {offsets = [0, 64], sizes = [8, 64], strides = [1, 1]} : vector<8x256xf32> to vector<8x64xf32>
    %241 = vector.extract_strided_slice %238 {offsets = [0, 128], sizes = [8, 64], strides = [1, 1]} : vector<8x256xf32> to vector<8x64xf32>
    %242 = vector.extract_strided_slice %238 {offsets = [0, 192], sizes = [8, 64], strides = [1, 1]} : vector<8x256xf32> to vector<8x64xf32>
    %243 = arith.mulf %240, %220 : vector<8x64xf32>
    %244 = arith.mulf %239, %241 : vector<8x64xf32>
    %245 = arith.addf %243, %244 : vector<8x64xf32>
    %246 = math.tanh %245 : vector<8x64xf32>
    %247 = arith.mulf %242, %246 : vector<8x64xf32>
    %c32_i32_56 = arith.constant 32 : i32
    %248 = vector.broadcast %c32_i32_56 : i32 to vector<8x64xi32>
    %249 = arith.cmpi sge, %13, %248 : vector<8x64xi32>
    %c64_i32 = arith.constant 64 : i32
    %250 = vector.broadcast %c64_i32 : i32 to vector<8x64xi32>
    %251 = arith.cmpi slt, %13, %250 : vector<8x64xi32>
    %252 = arith.andi %249, %251 : vector<8x64xi1>
    %253 = arith.select %252, %247, %222 : vector<8x64xi1>, vector<8x64xf32>
    %254 = vector.extract_strided_slice %253 {offsets = [0, 32], sizes = [8, 32], strides = [1, 1]} : vector<8x64xf32> to vector<8x32xf32>
    %c0_57 = arith.constant 0 : index
    %c0_58 = arith.constant 0 : index
    %255 = vector.load %arg7[%c0_57, %c0_58] : memref<32x8xf32, #tpu.memory_space<vmem>>, vector<32x8xf32>
    %cst_59 = arith.constant dense<0.000000e+00> : vector<8x8xf32>
    %256 = tpu.matmul %254, %255, %cst_59 {dimension_numbers = #tpu.dot_dimension_numbers<[1], [0], [0], [1], [0, 0, 1, 1], [], []>} : vector<8x32xf32>, vector<32x8xf32>, vector<8x8xf32> -> vector<8x8xf32>
    %c0_60 = arith.constant 0 : index
    %c0_61 = arith.constant 0 : index
    %257 = vector.load %arg8[%c0_60, %c0_61] : memref<1x8xf32, #tpu.memory_space<vmem>>, vector<1x8xf32>
    %258 = vector.broadcast %257 : vector<1x8xf32> to vector<8x8xf32>
    %259 = arith.addf %256, %258 : vector<8x8xf32>
    %c0_62 = arith.constant 0 : index
    %c0_63 = arith.constant 0 : index
    %260 = vector.load %arg9[%c0_62, %c0_63] : memref<8x8xf32, #tpu.memory_space<vmem>>, vector<8x8xf32>
    tpu.vector_store %arg9[%c0_62, %c0_63], %259 {strides = array<i32>} : memref<8x8xf32, #tpu.memory_space<vmem>>, vector<8x8xf32>,
    return
  }
  func.func @transform_0(%arg0: i32) -> (i32, i32) {
    %c0_i32 = arith.constant 0 : i32
    %c0_i32_0 = arith.constant 0 : i32
    %c0_i32_1 = arith.constant 0 : i32
    return %c0_i32, %c0_i32_0 : i32, i32
  }
  func.func @transform_1(%arg0: i32) -> (i32, i32) {
    %c0_i32 = arith.constant 0 : i32
    %c0_i32_0 = arith.constant 0 : i32
    %c0_i32_1 = arith.constant 0 : i32
    return %c0_i32, %c0_i32_0 : i32, i32
  }
  func.func @transform_2(%arg0: i32) -> (i32, i32) {
    %c0_i32 = arith.constant 0 : i32
    %c0_i32_0 = arith.constant 0 : i32
    %c0_i32_1 = arith.constant 0 : i32
    return %c0_i32, %c0_i32_0 : i32, i32
  }
  func.func @transform_3(%arg0: i32) -> (i32, i32) {
    %c0_i32 = arith.constant 0 : i32
    %c0_i32_0 = arith.constant 0 : i32
    %c0_i32_1 = arith.constant 0 : i32
    return %c0_i32, %c0_i32_0 : i32, i32
  }
  func.func @transform_4(%arg0: i32) -> (i32, i32) {
    %c0_i32 = arith.constant 0 : i32
    %c0_i32_0 = arith.constant 0 : i32
    %c0_i32_1 = arith.constant 0 : i32
    return %c0_i32, %c0_i32_0 : i32, i32
  }
  func.func @transform_5(%arg0: i32) -> (i32, i32) {
    %c0_i32 = arith.constant 0 : i32
    %c0_i32_0 = arith.constant 0 : i32
    %c0_i32_1 = arith.constant 0 : i32
    return %c0_i32, %c0_i32_0 : i32, i32
  }
  func.func @transform_6(%arg0: i32) -> (i32, i32) {
    %c0_i32 = arith.constant 0 : i32
    %c0_i32_0 = arith.constant 0 : i32
    %c0_i32_1 = arith.constant 0 : i32
    return %c0_i32, %c0_i32_0 : i32, i32
  }
  func.func @transform_7(%arg0: i32) -> (i32, i32) {
    %c0_i32 = arith.constant 0 : i32
    %c0_i32_0 = arith.constant 0 : i32
    %c0_i32_1 = arith.constant 0 : i32
    return %c0_i32, %c0_i32_0 : i32, i32
  }
  func.func @transform_8(%arg0: i32) -> (i32, i32) {
    %c0_i32 = arith.constant 0 : i32
    %c0_i32_0 = arith.constant 0 : i32
    %c0_i32_1 = arith.constant 0 : i32
    return %c0_i32, %c0_i32_0 : i32, i32
  }
}

</mosaic_0001>

<bundles_post_ra>
// kernel: tpu_custom_call.1
= control target key start
LH: loop header
LB: loop body
LE: loop exit
PB: predicated region body
PF: predicated region fallthrough
CT: control target
= control target key end

     0   :  { %13 = vsyncpa [#allocation3], 0  ;;  %s2235_s0 = inlined_call_operand.vmem [shape: f32[72,16], index: 0, kind: input, shape index: {}]   ;;  %s2236_s1 = inlined_call_operand.vmem [shape: f32[8,64], index: 1, kind: input, shape index: {}]   ;;  %s2237_s2 = inlined_call_operand.hbm [shape: f32[8,64], index: 2, kind: input, shape index: {}]   ;;  %s2238_s3 = inlined_call_operand.hbm [shape: f32[16,256], index: 3, kind: input, shape index: {}]   ;;  %s2239_s4 = inlined_call_operand.vmem [shape: f32[1,256], index: 4, kind: input, shape index: {}]   ;;  %s2240_s5 = inlined_call_operand.vmem [shape: f32[64,256], index: 5, kind: input, shape index: {}]   ;;  %s2241_s6 = inlined_call_operand.vmem [shape: f32[32,8], index: 6, kind: input, shape index: {}]   ;;  %s2242_s7 = inlined_call_operand.vmem [shape: f32[1,8], index: 7, kind: input, shape index: {}]   ;;  %s2243_s8 = inlined_call_operand.hbm [shape: f32[8,8], index: 8, kind: output, shape index: {}]  }
   0x1   :  { %14 = vsyncpa [#allocation6], 0 }
   0x2   :  { %15 = vsyncpa [#allocation4], 0  ;;  %s1784_s27 = smov [#allocation2]   ;;  %s1785_s29 = smov [#allocation5]  }
   0x3   :  { %s26_s28 = sshll.u32 %s1784_s27, 4  ;;  %s35_s30 = sshll.u32 %s1785_s29, 4  ;;  %s27_s28 = int_to_ptr.vmem [resolvable:$true] %s26_s28  ;;  %s1839_s30 = int_to_ptr.vmem [resolvable:$true] %s35_s30 }
   0x4   :  { %s1712_s11 = scalar_lea.hbm %s2237_s2, 128 }
   0x5   :  { %p1713_p0 = scmp.ne.s32.totalorder %s2237_s2, %s1712_s11  ;;  %p1716_p1 = scmp.lt.u32.totalorder %s1712_s11, %s2237_s2 }
   0x7   :  { %p1718_p2 = pnand %p1716_p1, %p1713_p0 }
   0x9   :  { %1721 = shalt.err (!%p1718_p2)
}
   0xa   :  { %s1722_s16 = scalar_lea.vmem %s27_s28, 128  ;;  %p1727_p4 = scmp.lt.s32.totalorder %s27_s28, %s27_s28 }
   0xb   :  { %p1723_p3 = scmp.ne.s32.totalorder %s27_s28, %s1722_s16  ;;  %p1728_p5 = scmp.lt.s32.totalorder %s1722_s16, %s1722_s16 }
   0xd   :  { %p1729_p6 = por %p1728_p5, %p1727_p4 }
   0xf   :  { %p1730_p7 = pnand %p1729_p6, %p1723_p3 }
  0x11   :  { %1733 = shalt.err (!%p1730_p7)
}
  0x12   :  { %29 = dma.hbm_to_vmem [thread:$0]  %s2237_s2, 128, %s27_s28, [#allocation3]  }
  0x13   :  { %s1734_s21 = scalar_lea.hbm %s2238_s3, 512 }
  0x14   :  { %p1735_p8 = scmp.ne.s32.totalorder %s2238_s3, %s1734_s21  ;;  %p1738_p9 = scmp.lt.u32.totalorder %s1734_s21, %s2238_s3 }
  0x16   :  { %p1740_p10 = pnand %p1738_p9, %p1735_p8 }
  0x18   :  { %1743 = shalt.err (!%p1740_p10)
}
  0x19   :  { %s1744_s26 = scalar_lea.vmem %s1839_s30, 512  ;;  %p1749_p12 = scmp.lt.s32.totalorder %s1839_s30, %s1839_s30 }
  0x1a   :  { %p1745_p11 = scmp.ne.s32.totalorder %s1839_s30, %s1744_s26  ;;  %p1750_p13 = scmp.lt.s32.totalorder %s1744_s26, %s1744_s26 }
  0x1c   :  { %p1751_p0 = por %p1750_p13, %p1749_p12 }
  0x1e   :  { %p1752_p1 = pnand %p1751_p0, %p1745_p11 }
  0x20   :  { %1755 = shalt.err (!%p1752_p1)
}
  0x21   :  { %s1786_s2 = smov 256   ;;  %s1787_s27 = smov 16  }
  0x22   :  { %41 = dma.hbm_to_vmem [thread:$0]  %s2238_s3, 512, %s1839_s30, [#allocation6], %s1786_s2, %s1786_s2, %s1787_s27  }
  0x23   :  { %1778 = dma.done.wait [#allocation3], 128  }
  0x24   :  { %1779 = vsyncadd [#allocation3], 4294967168 }
  0x25   :  { %1780 = dma.done.wait [#allocation6], 512  }
  0x26   :  { %1781 = vsyncadd [#allocation6], 4294966784  ;;  %v1788_v0 = vmov 0.0   ;;  %v66_v1 = vld [vmem:[#allocation5 + $0x8] sm:$0xff]  ;;  %v68_v2 = vld [vmem:[#allocation5 + $0x18] sm:$0xff]  ;;  %vm81_vm0 = vcmask 130048   ;;  %v71_v48 = vlaneseq }
  0x27   :  { %173 = vmatprep.mubr.f32.mxu1 %v1788_v0  ;;  %663 = vmatprep.mubr.f32.mxu0 %v1788_v0  ;;  %v65_v3 = vld [vmem:[#allocation5] sm:$0xff]  ;;  %v1422_v4 = vpack.c.bf16 %v68_v2, %v66_v1  ;;  %v67_v5 = vld [vmem:[#allocation5 + $0x10] sm:$0xff]  ;;  %v228_v9 = vld [vmem:[%s2240_s5] sm:$0xff]  ;;  %s1789_s15 = smov 64   ;;  %vm255_vm1 = vcmask 523264   ;;  %vm1791_vm4 = vmmov 0  }
  0x28   :  { %v229_v6 = vld [vmem:[%s2240_s5 + $0x8] sm:$0xff]  ;;  %v1424_v7 = vpack.c.bf16 %v67_v5, %v65_v3  ;;  %v231_v8 = vld [vmem:[%s2240_s5 + $0x18] sm:$0xff]  ;;  %v230_v10 = vld [vmem:[%s2240_s5 + $0x10] sm:$0xff]  ;;  %v72_v51 = vshrl.u32 %v71_v48, 7  ;;  %v2039_v54 = vand.u32 127, %v71_v48  ;;  %s1792_s19 = smov 96  }
  0x29   :  { %1423 = vmatprep.subr.bf16.mxu1 %v1422_v4  ;;  %v1884_v11 = vpack.c.bf16 %v231_v8, %v229_v6  ;;  %v233_v12 = vld [vmem:[%s2240_s5 + $0x28] sm:$0xff]  ;;  %v56_v13 = vld [vmem:[%s2235_s0] sm:$0xff]  ;;  %v1892_v14 = vpack.c.bf16 %v230_v10, %v228_v9  ;;  %v235_v15 = vld [vmem:[%s2240_s5 + $0x38] sm:$0xff]  ;;  %vm1259_vm8 = vcmask 261120   ;;  %s1793_s21 = smov [#allocation7]   ;;  %vm1332_vm9 = vcmask 64512  }
  0x2a   :  { %1425 = vmatpush1.bf16.msra.mxu1 %v1424_v7  ;;  %v1898_v16 = vpack.c.bf16 %v235_v15, %v233_v12  ;;  %v232_v17 = vld [vmem:[%s2240_s5 + $0x20] sm:$0xff]  ;;  %v234_v18 = vld [vmem:[%s2240_s5 + $0x30] sm:$0xff]  ;;  %v237_v19 = vld [vmem:[%s2240_s5 + $0x48] sm:$0xff]  ;;  %v73_v55 = vsub.s32 0, %v72_v51  ;;  %v77_v56 = vsub.s32 1, %v72_v51  ;;  %v2049_v60 = vadd.s32 128, %v2039_v54 }
  0x2b   :  { %1427 = vmatprep.subr.bf16.mxu1 %v1884_v11  ;;  %1475 = vmatprep.subr.bf16.mxu0 %v1884_v11  ;;  %v239_v20 = vld [vmem:[%s2240_s5 + $0x58] sm:$0xff]  ;;  %v57_v21 = vld [vmem:[%s2235_s0 + $0x8] sm:$0xff]  ;;  %v1921_v22 = vpack.c.bf16 %v234_v18, %v232_v17  ;;  %v236_v24 = vld [vmem:[%s2240_s5 + $0x40] sm:$0xff]  ;;  %vm366_vm3 = vcmp.lt.s32.totalorder %v2039_v54, 32  ;;  %vm1236_vm5 = vcmp.ge.s32.totalorder %v2039_v54, 32  ;;  %vm1237_vm6 = vcmp.lt.s32.totalorder %v2039_v54, 64 }
  0x2c   :  { %1477 = vmatpush1.bf16.msra.mxu0 %v1892_v14  ;;  %v1924_v23 = vpack.c.bf16 %v239_v20, %v237_v19  ;;  %v238_v25 = vld [vmem:[%s2240_s5 + $0x50] sm:$0xff]  ;;  %v241_v26 = vld [vmem:[%s2240_s5 + $0x68] sm:$0xff]  ;;  %v243_v27 = vld [vmem:[%s2240_s5 + $0x78] sm:$0xff]  ;;  %vm250_vm2 = vcmp.lt.s32.totalorder %v2049_v60, 192  ;;  %s1340_s22 = sshll.u32 %s1793_s21, 4  ;;  %s1341_s22 = int_to_ptr.vmem [resolvable:$true] %s1340_s22 }
  0x2d   :  { %1350 = vmatmul.mubr.msk.f32.vlgmr.msra.gmra.mrb[0].mxu1 %vm81_vm0, %v56_v13  ;;  %1479 = vmatprep.subr.bf16.mxu0 %v1898_v16  ;;  %v1938_v28 = vld [vmem:[#allocation2] sm:$0xff]  ;;  %v58_v29 = vld [vmem:[%s2235_s0 + $0x10] sm:$0xff]  ;;  %v1949_v30 = vpack.c.bf16 %v238_v25, %v236_v24  ;;  %v1952_v31 = vpack.c.bf16 %v243_v27, %v241_v26  ;;  %v59_v34 = vld [vmem:[%s2235_s0 + $0x18] sm:$0xff]  ;;  %p1761_p3 = scmp.lt.s32.totalorder %s1341_s22, %s1341_s22 }
  0x2e   :  { %1429 = vmatpush1.bf16.msra.mxu1 %v1892_v14  ;;  %179 = vmatprep.mubr.f32.mxu1 %v1788_v0  ;;  %v240_v32 = vld [vmem:[%s2240_s5 + $0x60] sm:$0xff]  ;;  %v242_v33 = vld [vmem:[%s2240_s5 + $0x70] sm:$0xff]  ;;  %v61_v37 = vld [vmem:[%s2235_s0 + $0x28] sm:$0xff] }
  0x2f   :  { %1431 = vmatprep.subr.bf16.mxu1 %v1898_v16  ;;  %353 = vrot.lane.b32.xlu0 %v1938_v28, %s1789_s15  ;;  %v1969_v35 = vpack.c.bf16 %v242_v33, %v240_v32  ;;  %v60_v36 = vld [vmem:[%s2235_s0 + $0x20] sm:$0xff]  ;;  %v62_v38 = vld [vmem:[%s2235_s0 + $0x30] sm:$0xff]  ;;  %v63_v39 = vld [vmem:[%s2235_s0 + $0x38] sm:$0xff] }
  0x30   :  { %1481 = vmatpush1.bf16.msra.mxu0 %v1921_v22  ;;  %v64_v40 = vld [vmem:[%s2235_s0 + $0x40] sm:$0xff]  ;;  %v1247_v60 = vld [vmem:[%s2241_s6 + $0x10] sm:$0xff]  ;;  %vm1238_vm7 = vmand %vm1236_vm5, %vm1237_vm6 }
  0x31   :  { %1351 = vmatmul.mubr.msk.f32.gmra.mrb[2].mxu1 %vm81_vm0, %v57_v21  ;;  %1483 = vmatprep.subr.bf16.mxu0 %v1924_v23  ;;  %v2006_v41 = vld [vmem:[%s2236_s1] sm:$0xff] }
  0x32   :  { %185 = vmatprep.mubr.f32.mxu1 %v1788_v0  ;;  %1433 = vmatpush1.bf16.msra.mxu1 %v1921_v22  ;;  %v69_v58 = vld [vmem:[%s2239_s4] sm:$0x3] }
  0x33   :  { %1435 = vmatprep.subr.bf16.mxu1 %v1924_v23  ;;  %v2051_v61 = vrot.slane %v69_v58, %v73_v55  ;;  %v2053_v62 = vrot.slane %v69_v58, %v77_v56 }
  0x34   :  { %1485 = vmatpush1.bf16.msra.mxu0 %v1949_v30 }
  0x35   :  { %1352 = vmatmul.mubr.msk.f32.gmra.mrb[4].mxu1 %vm81_vm0, %v58_v29  ;;  %1487 = vmatprep.subr.bf16.mxu0 %v1952_v31 }
  0x36   :  { %191 = vmatprep.mubr.f32.mxu1 %v1788_v0  ;;  %1437 = vmatpush1.bf16.msra.mxu1 %v1949_v30 }
  0x37   :  { %1439 = vmatprep.subr.bf16.mxu1 %v1952_v31 }
  0x38   :  { %1489 = vmatpush1.bf16.msra.mxu0 %v1969_v35 }
  0x39   :  { %1353 = vmatmul.mubr.msk.f32.gmra.mrb[6].mxu1 %vm81_vm0, %v59_v34  ;;  %1491 = vmatprep.subr.bf16.mxu0 %v1884_v11 }
  0x3a   :  { %197 = vmatprep.mubr.f32.mxu1 %v1788_v0  ;;  %1441 = vmatpush1.bf16.msra.mxu1 %v1969_v35 }
  0x3b   :  { %1443 = vmatprep.subr.bf16.mxu1 %v1884_v11 }
  0x3d   :  { %1354 = vmatmul.mubr.msk.f32.gmra.mrb[8].mxu1 %vm81_vm0, %v60_v36 }
  0x3e   :  { %203 = vmatprep.mubr.f32.mxu1 %v1788_v0 }
  0x41   :  { %1355 = vmatmul.mubr.msk.f32.gmra.mrb[10].mxu1 %vm81_vm0, %v61_v37 }
  0x42   :  { %209 = vmatprep.mubr.f32.mxu1 %v1788_v0 }
  0x45   :  { %1356 = vmatmul.mubr.msk.f32.gmra.mrb[12].mxu1 %vm81_vm0, %v62_v38 }
  0x46   :  { %215 = vmatprep.mubr.f32.mxu1 %v1788_v0 }
  0x49   :  { %1357 = vmatmul.mubr.msk.f32.gmra.mrb[14].mxu1 %vm81_vm0, %v63_v39 }
  0x4a   :  { %221 = vmatprep.mubr.f32.mxu1 %v1788_v0 }
  0x4d   :  { %1358 = vmatmul.mubr.msk.f32.gmra.mrb[16].mxu1 %vm81_vm0, %v64_v40 }
  0x4e   :  { %323 = vmatprep.mubr.f32.mxu1 %v1788_v0 }
  0x51   :  { %1359 = vmatmul.mubr.msk.f32.vlgmr.msra.gmra.mrb[0].mxu1 %vm255_vm1, %v2006_v41 }
  0x52   :  { %1445 = vmatpush1.bf16.msra.mxu1 %v1892_v14  ;;  %445 = vmatprep.mubr.f32.mxu1 %v1788_v0 }
  0x53   :  { %1447 = vmatprep.subr.bf16.mxu1 %v1898_v16 }
  0x56   :  { %1449 = vmatpush1.bf16.msra.mxu1 %v1921_v22 }
  0x57   :  { %1451 = vmatprep.subr.bf16.mxu1 %v1924_v23 }
  0x5a   :  { %1453 = vmatpush1.bf16.msra.mxu1 %v1949_v30 }
  0x5b   :  { %1455 = vmatprep.subr.bf16.mxu1 %v1952_v31 }
  0x5e   :  { %1457 = vmatpush1.bf16.msra.mxu1 %v1969_v35 }
  0x5f   :  { %1459 = vmatprep.subr.bf16.mxu1 %v1884_v11 }
  0xa1   :  { %v354_v21 = vpop.permute.xlu0 %353 }
 0x10c   :  { %v2019_v42 = vpop.f32.mrb[6].mxu1 }
 0x10d   :  { %v2021_v43 = vpop.f32.mrb[7].mxu1 }
 0x110   :  { %v2023_v44 = vpop.f32.mrb[8].mxu1 }
 0x111   :  { %v2025_v45 = vpop.f32.mrb[9].mxu1 }
 0x114   :  { %v2027_v46 = vpop.f32.mrb[10].mxu1 }
 0x115   :  { %v2029_v47 = vpop.f32.mrb[11].mxu1 }
 0x118   :  { %v2031_v49 = vpop.f32.mrb[12].mxu1 }
 0x119   :  { %v2033_v50 = vpop.f32.mrb[13].mxu1 }
 0x11c   :  { %v2035_v52 = vpop.f32.mrb[14].mxu1 }
 0x11d   :  { %v2037_v53 = vpop.f32.mrb[15].mxu1 }
 0x120   :  { %v2041_v57 = vpop.f32.mrb[16].mxu1 }
 0x121   :  { %v2046_v59 = vpop.f32.mrb[17].mxu1 }
 0x124   :  { %v325_v63 = vpop.f32.mrb[0].mxu1 }
 0x125   :  { %v327_v1 = vpop.f32.mrb[1].mxu1  ;;  %v1576_v2 = vadd.f32 %v325_v63, %v2051_v61 }
 0x126   :  { %v1577_v3 = vadd.f32 %v327_v1, %v2053_v62 }
 0x127   :  { %v1360_v5 = vmul.f32 -1.442695, %v1576_v2 }
 0x128   :  { %v331_v4 = vmul.f32 2.0, %v1577_v3 }
 0x12a   :  { %v333_v6 = vsel %vm250_vm2, %v331_v4, %v1577_v3 }
 0x12b   :  { %v1361_v7 = vmul.f32 -1.442695, %v333_v6 }
 0x12d   :  { %1622 = vpow2.f32 %v1361_v7 }
 0x12e   :  { %1624 = vpow2.f32 %v1360_v5 }
 0x137   :  { %v1623_v8 = vpop.eup %1622 }
 0x138   :  { %v1625_v9 = vpop.eup %1624  ;;  %v341_v10 = vadd.f32 1.0, %v1623_v8 }
 0x139   :  { %v340_v12 = vadd.f32 1.0, %v1625_v9 }
 0x13a   :  { %1626 = vrcp.f32 %v341_v10 }
 0x13b   :  { %1628 = vrcp.f32 %v340_v12 }
 0x144   :  { %v1627_v13 = vpop.eup %1626 }
 0x145   :  { %v347_v15 = vmul.f32 2.0, %v1627_v13  ;;  %v1629_v18 = vpop.eup %1628 }
 0x146   :  { %v356_v24 = vmul.f32 %v1629_v18, %v354_v21 }
 0x147   :  { %v1363_v17 = vadd.f32 -1.0, %v347_v15 }
 0x149   :  { %v351_v19 = vsel %vm250_vm2, %v1363_v17, %v1627_v13 }
 0x14a   :  { %v357_v20 = vmul.f32 %v1629_v18, %v351_v19 }
 0x14c   :  { %359 = vrot.lane.b32.xlu0 %v357_v20, %s1789_s15 }
 0x1be   :  { %v360_v25 = vpop.permute.xlu0 %359 }
 0x1bf   :  { %v362_v26 = vadd.f32 %v360_v25, %v356_v24 }
 0x1c1   :  { %1630 = vtanh.f32 %v362_v26 }
 0x1cb   :  { %v1631_v27 = vpop.eup %1630 }
 0x1cc   :  { %v364_v29 = vmul.f32 %v1631_v27, %v351_v19 }
 0x1ce   :  { %369 = vrot.lane.b32.xlu1 %v364_v29, %s1789_s15 }
 0x1d2   :  { %374 = vrot.lane.b32.xlu1 %v362_v26, %s1789_s15 }
 0x240   :  { %v370_v32 = vpop.permute.xlu1 %369 }
 0x241   :  { %v372_v33 = vsel %vm366_vm3, %v370_v32, %v2006_v41 }
 0x242   :  { %1364 = vmatmul.mubr.msk.f32.vlgmr.msra.gmra.mrb[2].mxu1 %vm255_vm1, %v372_v33 }
 0x243   :  { %1461 = vmatpush1.bf16.msra.mxu1 %v1892_v14  ;;  %556 = vmatprep.mubr.f32.mxu1 %v1788_v0 }
 0x244   :  { %v375_v34 = vpop.permute.xlu1 %374  ;;  %1463 = vmatprep.subr.bf16.mxu1 %v1898_v16 }
 0x245   :  { %v377_v36 = vsel %vm366_vm3, %v375_v34, %v1938_v28 }
 0x246   :  { %475 = vrot.lane.b32.xlu0 %v377_v36, %s1789_s15 }
 0x247   :  { %1465 = vmatpush1.bf16.msra.mxu1 %v1921_v22 }
 0x248   :  { %1467 = vmatprep.subr.bf16.mxu1 %v1924_v23 }
 0x24b   :  { %1469 = vmatpush1.bf16.msra.mxu1 %v1949_v30 }
 0x24c   :  { %1471 = vmatprep.subr.bf16.mxu1 %v1952_v31 }
 0x24f   :  { %1473 = vmatpush1.bf16.msra.mxu1 %v1969_v35 }
 0x2b8   :  { %v476_v7 = vpop.permute.xlu0 %475 }
 0x315   :  { %v447_v37 = vpop.f32.mrb[2].mxu1 }
 0x316   :  { %v449_v38 = vpop.f32.mrb[3].mxu1  ;;  %v1578_v39 = vadd.f32 %v447_v37, %v2051_v61 }
 0x317   :  { %v1579_v40 = vadd.f32 %v449_v38, %v2053_v62 }
 0x318   :  { %v1365_v28 = vmul.f32 -1.442695, %v1578_v39 }
 0x319   :  { %v453_v41 = vmul.f32 2.0, %v1579_v40 }
 0x31b   :  { %v455_v48 = vsel %vm250_vm2, %v453_v41, %v1579_v40 }
 0x31c   :  { %v1366_v51 = vmul.f32 -1.442695, %v455_v48 }
 0x31e   :  { %1632 = vpow2.f32 %v1366_v51 }
 0x31f   :  { %1634 = vpow2.f32 %v1365_v28 }
 0x328   :  { %v1633_v55 = vpop.eup %1632 }
 0x329   :  { %v1635_v56 = vpop.eup %1634  ;;  %v463_v58 = vadd.f32 1.0, %v1633_v55 }
 0x32a   :  { %v462_v63 = vadd.f32 1.0, %v1635_v56 }
 0x32b   :  { %1636 = vrcp.f32 %v463_v58  ;;  %v194_v58 = vadd.f32 %v2019_v42, %v2051_v61 }
 0x32c   :  { %1638 = vrcp.f32 %v462_v63  ;;  %v196_v63 = vadd.f32 %v2021_v43, %v2053_v62 }
 0x335   :  { %v1637_v1 = vpop.eup %1636 }
 0x336   :  { %v469_v2 = vmul.f32 2.0, %v1637_v1  ;;  %v1639_v4 = vpop.eup %1638 }
 0x337   :  { %v478_v8 = vmul.f32 %v1639_v4, %v476_v7 }
 0x338   :  { %v1368_v3 = vadd.f32 -1.0, %v469_v2 }
 0x33a   :  { %v473_v5 = vsel %vm250_vm2, %v1368_v3, %v1637_v1 }
 0x33b   :  { %v479_v6 = vmul.f32 %v1639_v4, %v473_v5 }
 0x33d   :  { %481 = vrot.lane.b32.xlu1 %v479_v6, %s1789_s15 }
 0x3af   :  { %v482_v9 = vpop.permute.xlu1 %481 }
 0x3b0   :  { %v484_v10 = vadd.f32 %v482_v9, %v478_v8 }
 0x3b2   :  { %1640 = vtanh.f32 %v484_v10 }
 0x3bc   :  { %v1641_v12 = vpop.eup %1640 }
 0x3bd   :  { %v486_v13 = vmul.f32 %v1641_v12, %v473_v5 }
 0x3bf   :  { %488 = vrot.lane.b32.xlu0 %v486_v13, %s1789_s15 }
 0x431   :  { %v489_v15 = vpop.permute.xlu0 %488 }
 0x432   :  { %1369 = vmatmul.mubr.msk.f32.vlgmr.msra.gmra.mrb[4].mxu1 %vm255_vm1, %v489_v15 }
 0x433   :  { %1419 = vmatprep.mubr.msk.f32.mxu1 %vm1791_vm4, %v1788_v0 }
 0x505   :  { %v558_v17 = vpop.f32.mrb[4].mxu1 }
 0x506   :  { %v560_v18 = vpop.f32.mrb[5].mxu1  ;;  %v1580_v19 = vadd.f32 %v558_v17, %v2051_v61 }
 0x507   :  { %v1581_v20 = vadd.f32 %v560_v18, %v2053_v62 }
 0x508   :  { %v1370_v24 = vmul.f32 -1.442695, %v1580_v19 }
 0x509   :  { %v564_v21 = vmul.f32 2.0, %v1581_v20 }
 0x50b   :  { %v566_v25 = vsel %vm250_vm2, %v564_v21, %v1581_v20 }
 0x50c   :  { %v1371_v26 = vmul.f32 -1.442695, %v566_v25 }
 0x50e   :  { %1642 = vpow2.f32 %v1371_v26 }
 0x50f   :  { %1644 = vpow2.f32 %v1370_v24 }
 0x518   :  { %v1643_v27 = vpop.eup %1642 }
 0x519   :  { %v1645_v29 = vpop.eup %1644  ;;  %v574_v32 = vadd.f32 1.0, %v1643_v27 }
 0x51a   :  { %v573_v33 = vadd.f32 1.0, %v1645_v29  ;;  %v200_v29 = vadd.f32 %v2023_v44, %v2051_v61 }
 0x51b   :  { %1646 = vrcp.f32 %v574_v32  ;;  %v202_v32 = vadd.f32 %v2025_v45, %v2053_v62 }
 0x51c   :  { %1648 = vrcp.f32 %v573_v33 }
 0x525   :  { %v1647_v34 = vpop.eup %1646 }
 0x526   :  { %v580_v36 = vmul.f32 2.0, %v1647_v34  ;;  %v1649_v38 = vpop.eup %1648 }
 0x527   :  { %v585_v41 = vmul.f32 %v1649_v38, %v484_v10 }
 0x528   :  { %v1373_v37 = vadd.f32 -1.0, %v580_v36 }
 0x52a   :  { %v584_v39 = vsel %vm250_vm2, %v1373_v37, %v1647_v34 }
 0x52b   :  { %v586_v40 = vmul.f32 %v1649_v38, %v584_v39 }
 0x52d   :  { %588 = vrot.lane.b32.xlu1 %v586_v40, %s1789_s15 }
 0x59f   :  { %v589_v28 = vpop.permute.xlu1 %588 }
 0x5a0   :  { %v591_v48 = vadd.f32 %v589_v28, %v585_v41 }
 0x5a2   :  { %1650 = vtanh.f32 %v591_v48 }
 0x5ac   :  { %v1651_v51 = vpop.eup %1650 }
 0x5ad   :  { %v593_v55 = vmul.f32 %v1651_v51, %v584_v39 }
 0x5af   :  { %595 = vrot.lane.b32.xlu0 %v593_v55, %s1789_s15 }
 0x621   :  { %v596_v56 = vpop.permute.xlu0 %595 }
 0x622   :  { %1374 = vmatmul.mubr.msk.f32.vlgmr.msra.gmra.mrb[0].mxu0 %vm255_vm1, %v596_v56 }
 0x623   :  { %1493 = vmatpush1.bf16.msra.mxu0 %v1892_v14  ;;  %770 = vmatprep.mubr.f32.mxu0 %v1788_v0 }
 0x624   :  { %1495 = vmatprep.subr.bf16.mxu0 %v1898_v16 }
 0x627   :  { %1497 = vmatpush1.bf16.msra.mxu0 %v1921_v22 }
 0x628   :  { %1499 = vmatprep.subr.bf16.mxu0 %v1924_v23 }
 0x62b   :  { %1501 = vmatpush1.bf16.msra.mxu0 %v1949_v30 }
 0x62c   :  { %1503 = vmatprep.subr.bf16.mxu0 %v1952_v31 }
 0x62f   :  { %1505 = vmatpush1.bf16.msra.mxu0 %v1969_v35 }
 0x630   :  { %1507 = vmatprep.subr.bf16.mxu0 %v1884_v11 }
 0x6f5   :  { %v665_v1 = vpop.f32.mrb[0].mxu0 }
 0x6f6   :  { %v666_v2 = vadd.f32 %v665_v1, %v194_v58  ;;  %v667_v3 = vpop.f32.mrb[1].mxu0 }
 0x6f7   :  { %v668_v4 = vadd.f32 %v667_v3, %v196_v63 }
 0x6f8   :  { %v1375_v6 = vmul.f32 -1.442695, %v666_v2 }
 0x6f9   :  { %v671_v5 = vmul.f32 2.0, %v668_v4 }
 0x6fb   :  { %v673_v7 = vsel %vm250_vm2, %v671_v5, %v668_v4 }
 0x6fc   :  { %v1376_v8 = vmul.f32 -1.442695, %v673_v7 }
 0x6fe   :  { %1652 = vpow2.f32 %v1376_v8  ;;  %v206_v8 = vadd.f32 %v2027_v46, %v2051_v61 }
 0x6ff   :  { %1654 = vpow2.f32 %v1375_v6 }
 0x708   :  { %v1653_v9 = vpop.eup %1652 }
 0x709   :  { %v1655_v10 = vpop.eup %1654  ;;  %v681_v12 = vadd.f32 1.0, %v1653_v9  ;;  %v208_v9 = vadd.f32 %v2029_v47, %v2053_v62 }
 0x70a   :  { %v680_v42 = vadd.f32 1.0, %v1655_v10 }
 0x70b   :  { %1656 = vrcp.f32 %v681_v12 }
 0x70c   :  { %1658 = vrcp.f32 %v680_v42 }
 0x715   :  { %v1657_v13 = vpop.eup %1656 }
 0x716   :  { %v687_v43 = vmul.f32 2.0, %v1657_v13  ;;  %v1659_v17 = vpop.eup %1658 }
 0x717   :  { %v692_v20 = vmul.f32 %v1659_v17, %v591_v48 }
 0x718   :  { %v1378_v15 = vadd.f32 -1.0, %v687_v43 }
 0x71a   :  { %v691_v18 = vsel %vm250_vm2, %v1378_v15, %v1657_v13 }
 0x71b   :  { %v693_v19 = vmul.f32 %v1659_v17, %v691_v18 }
 0x71d   :  { %695 = vrot.lane.b32.xlu1 %v693_v19, %s1789_s15 }
 0x78f   :  { %v696_v21 = vpop.permute.xlu1 %695 }
 0x790   :  { %v698_v24 = vadd.f32 %v696_v21, %v692_v20 }
 0x792   :  { %1660 = vtanh.f32 %v698_v24 }
 0x79c   :  { %v1661_v25 = vpop.eup %1660 }
 0x79d   :  { %v700_v26 = vmul.f32 %v1661_v25, %v691_v18 }
 0x79f   :  { %702 = vrot.lane.b32.xlu0 %v700_v26, %s1789_s15 }
 0x811   :  { %v703_v27 = vpop.permute.xlu0 %702 }
 0x812   :  { %1379 = vmatmul.mubr.msk.f32.vlgmr.msra.gmra.mrb[2].mxu0 %vm255_vm1, %v703_v27 }
 0x813   :  { %1509 = vmatpush1.bf16.msra.mxu0 %v1892_v14  ;;  %877 = vmatprep.mubr.f32.mxu0 %v1788_v0 }
 0x814   :  { %1511 = vmatprep.subr.bf16.mxu0 %v1898_v16 }
 0x817   :  { %1513 = vmatpush1.bf16.msra.mxu0 %v1921_v22 }
 0x818   :  { %1515 = vmatprep.subr.bf16.mxu0 %v1924_v23 }
 0x81b   :  { %1517 = vmatpush1.bf16.msra.mxu0 %v1949_v30 }
 0x81c   :  { %1519 = vmatprep.subr.bf16.mxu0 %v1952_v31 }
 0x81f   :  { %1521 = vmatpush1.bf16.msra.mxu0 %v1969_v35 }
 0x820   :  { %1523 = vmatprep.subr.bf16.mxu0 %v1884_v11 }
 0x8e5   :  { %v772_v33 = vpop.f32.mrb[2].mxu0 }
 0x8e6   :  { %v773_v34 = vadd.f32 %v772_v33, %v200_v29  ;;  %v774_v36 = vpop.f32.mrb[3].mxu0 }
 0x8e7   :  { %v775_v37 = vadd.f32 %v774_v36, %v202_v32 }
 0x8e8   :  { %v1380_v39 = vmul.f32 -1.442695, %v773_v34 }
 0x8e9   :  { %v778_v38 = vmul.f32 2.0, %v775_v37 }
 0x8eb   :  { %v780_v40 = vsel %vm250_vm2, %v778_v38, %v775_v37 }
 0x8ec   :  { %v1381_v41 = vmul.f32 -1.442695, %v780_v40  ;;  %v214_v40 = vadd.f32 %v2033_v50, %v2053_v62 }
 0x8ee   :  { %1662 = vpow2.f32 %v1381_v41 }
 0x8ef   :  { %1664 = vpow2.f32 %v1380_v39  ;;  %v212_v39 = vadd.f32 %v2031_v49, %v2051_v61 }
 0x8f8   :  { %v1663_v28 = vpop.eup %1662 }
 0x8f9   :  { %v1665_v48 = vpop.eup %1664  ;;  %v788_v51 = vadd.f32 1.0, %v1663_v28 }
 0x8fa   :  { %v787_v44 = vadd.f32 1.0, %v1665_v48 }
 0x8fb   :  { %1666 = vrcp.f32 %v788_v51 }
 0x8fc   :  { %1668 = vrcp.f32 %v787_v44 }
 0x905   :  { %v1667_v55 = vpop.eup %1666 }
 0x906   :  { %v794_v45 = vmul.f32 2.0, %v1667_v55  ;;  %v1669_v58 = vpop.eup %1668 }
 0x907   :  { %v799_v2 = vmul.f32 %v1669_v58, %v698_v24 }
 0x908   :  { %v1383_v56 = vadd.f32 -1.0, %v794_v45 }
 0x90a   :  { %v798_v63 = vsel %vm250_vm2, %v1383_v56, %v1667_v55 }
 0x90b   :  { %v800_v1 = vmul.f32 %v1669_v58, %v798_v63 }
 0x90d   :  { %802 = vrot.lane.b32.xlu1 %v800_v1, %s1789_s15 }
 0x97f   :  { %v803_v3 = vpop.permute.xlu1 %802 }
 0x980   :  { %v805_v4 = vadd.f32 %v803_v3, %v799_v2 }
 0x982   :  { %1670 = vtanh.f32 %v805_v4 }
 0x98c   :  { %v1671_v5 = vpop.eup %1670 }
 0x98d   :  { %v807_v6 = vmul.f32 %v1671_v5, %v798_v63 }
 0x98f   :  { %809 = vrot.lane.b32.xlu0 %v807_v6, %s1789_s15 }
 0xa01   :  { %v810_v7 = vpop.permute.xlu0 %809 }
 0xa02   :  { %1384 = vmatmul.mubr.msk.f32.vlgmr.msra.gmra.mrb[4].mxu0 %vm255_vm1, %v810_v7 }
 0xa03   :  { %1525 = vmatpush1.bf16.msra.mxu0 %v1892_v14  ;;  %984 = vmatprep.mubr.f32.mxu0 %v1788_v0 }
 0xa04   :  { %1527 = vmatprep.subr.bf16.mxu0 %v1898_v16 }
 0xa07   :  { %1529 = vmatpush1.bf16.msra.mxu0 %v1921_v22 }
 0xa08   :  { %1531 = vmatprep.subr.bf16.mxu0 %v1924_v23 }
 0xa0b   :  { %1533 = vmatpush1.bf16.msra.mxu0 %v1949_v30 }
 0xa0c   :  { %1535 = vmatprep.subr.bf16.mxu0 %v1952_v31 }
 0xa0f   :  { %1537 = vmatpush1.bf16.msra.mxu0 %v1969_v35 }
 0xa10   :  { %1539 = vmatprep.subr.bf16.mxu0 %v1884_v11 }
 0xad5   :  { %v879_v10 = vpop.f32.mrb[4].mxu0 }
 0xad6   :  { %v880_v12 = vadd.f32 %v879_v10, %v206_v8  ;;  %v881_v42 = vpop.f32.mrb[5].mxu0 }
 0xad7   :  { %v882_v13 = vadd.f32 %v881_v42, %v208_v9  ;;  %v218_v42 = vadd.f32 %v2035_v52, %v2051_v61 }
 0xad8   :  { %v1385_v15 = vmul.f32 -1.442695, %v880_v12 }
 0xad9   :  { %v885_v43 = vmul.f32 2.0, %v882_v13 }
 0xadb   :  { %v887_v17 = vsel %vm250_vm2, %v885_v43, %v882_v13 }
 0xadc   :  { %v1386_v18 = vmul.f32 -1.442695, %v887_v17 }
 0xade   :  { %1672 = vpow2.f32 %v1386_v18 }
 0xadf   :  { %1674 = vpow2.f32 %v1385_v15 }
 0xae8   :  { %v1673_v19 = vpop.eup %1672 }
 0xae9   :  { %v1675_v20 = vpop.eup %1674  ;;  %v895_v21 = vadd.f32 1.0, %v1673_v19 }
 0xaea   :  { %v894_v46 = vadd.f32 1.0, %v1675_v20 }
 0xaeb   :  { %1676 = vrcp.f32 %v895_v21 }
 0xaec   :  { %1678 = vrcp.f32 %v894_v46 }
 0xaf5   :  { %v1677_v24 = vpop.eup %1676 }
 0xaf6   :  { %v901_v47 = vmul.f32 2.0, %v1677_v24  ;;  %v1679_v26 = vpop.eup %1678 }
 0xaf7   :  { %v906_v32 = vmul.f32 %v1679_v26, %v805_v4 }
 0xaf8   :  { %v1388_v25 = vadd.f32 -1.0, %v901_v47 }
 0xafa   :  { %v905_v27 = vsel %vm250_vm2, %v1388_v25, %v1677_v24 }
 0xafb   :  { %v907_v29 = vmul.f32 %v1679_v26, %v905_v27 }
 0xafd   :  { %909 = vrot.lane.b32.xlu1 %v907_v29, %s1789_s15 }
 0xb6f   :  { %v910_v33 = vpop.permute.xlu1 %909 }
 0xb70   :  { %v912_v34 = vadd.f32 %v910_v33, %v906_v32  ;;  %v224_v33 = vadd.f32 %v2041_v57, %v2051_v61 }
 0xb72   :  { %1680 = vtanh.f32 %v912_v34 }
 0xb7c   :  { %v1681_v36 = vpop.eup %1680 }
 0xb7d   :  { %v914_v37 = vmul.f32 %v1681_v36, %v905_v27 }
 0xb7f   :  { %916 = vrot.lane.b32.xlu0 %v914_v37, %s1789_s15 }
 0xbf1   :  { %v917_v38 = vpop.permute.xlu0 %916 }
 0xbf2   :  { %1389 = vmatmul.mubr.msk.f32.vlgmr.msra.gmra.mrb[6].mxu0 %vm255_vm1, %v917_v38 }
 0xbf3   :  { %1541 = vmatpush1.bf16.msra.mxu0 %v1892_v14  ;;  %1091 = vmatprep.mubr.f32.mxu0 %v1788_v0 }
 0xbf4   :  { %1543 = vmatprep.subr.bf16.mxu0 %v1898_v16 }
 0xbf7   :  { %1545 = vmatpush1.bf16.msra.mxu0 %v1921_v22 }
 0xbf8   :  { %1547 = vmatprep.subr.bf16.mxu0 %v1924_v23 }
 0xbfb   :  { %1549 = vmatpush1.bf16.msra.mxu0 %v1949_v30 }
 0xbfc   :  { %1551 = vmatprep.subr.bf16.mxu0 %v1952_v31 }
 0xbff   :  { %1553 = vmatpush1.bf16.msra.mxu0 %v1969_v35 }
 0xc00   :  { %1555 = vmatprep.subr.bf16.mxu0 %v1884_v11 }
 0xcc5   :  { %v986_v41 = vpop.f32.mrb[6].mxu0 }
 0xcc6   :  { %v987_v28 = vadd.f32 %v986_v41, %v212_v39  ;;  %v988_v48 = vpop.f32.mrb[7].mxu0 }
 0xcc7   :  { %v989_v51 = vadd.f32 %v988_v48, %v214_v40 }
 0xcc8   :  { %v1390_v55 = vmul.f32 -1.442695, %v987_v28 }
 0xcc9   :  { %v992_v44 = vmul.f32 2.0, %v989_v51 }
 0xccb   :  { %v994_v45 = vsel %vm250_vm2, %v992_v44, %v989_v51 }
 0xccc   :  { %v1391_v56 = vmul.f32 -1.442695, %v994_v45 }
 0xcce   :  { %1682 = vpow2.f32 %v1391_v56 }
 0xccf   :  { %1684 = vpow2.f32 %v1390_v55 }
 0xcd8   :  { %v1683_v58 = vpop.eup %1682 }
 0xcd9   :  { %v1685_v11 = vpop.eup %1684  ;;  %v1002_v63 = vadd.f32 1.0, %v1683_v58 }
 0xcda   :  { %v1001_v49 = vadd.f32 1.0, %v1685_v11 }
 0xcdb   :  { %1686 = vrcp.f32 %v1002_v63 }
 0xcdc   :  { %1688 = vrcp.f32 %v1001_v49 }
 0xce5   :  { %v1687_v1 = vpop.eup %1686 }
 0xce6   :  { %v1008_v50 = vmul.f32 2.0, %v1687_v1  ;;  %v1689_v3 = vpop.eup %1688 }
 0xce7   :  { %v1013_v6 = vmul.f32 %v1689_v3, %v912_v34  ;;  %v226_v34 = vadd.f32 %v2046_v59, %v2053_v62 }
 0xce8   :  { %v1393_v2 = vadd.f32 -1.0, %v1008_v50  ;;  %v1246_v50 = vld [vmem:[%s2241_s6 + $0x8] sm:$0xff] }
 0xcea   :  { %v1012_v4 = vsel %vm250_vm2, %v1393_v2, %v1687_v1  ;;  %v1245_v1 = vld [vmem:[%s2241_s6] sm:$0xff]  ;;  %v1790_v2 = vmov 0.0|0.0  }
 0xceb   :  { %v1014_v5 = vmul.f32 %v1689_v3, %v1012_v4  ;;  %1570 = vmatprep.subr.bf16.mxu1 %v1790_v2  ;;  %v1571_v3 = vpack.c.bf16 %v1246_v50, %v1245_v1 }
 0xced   :  { %1016 = vrot.lane.b32.xlu1 %v1014_v5, %s1789_s15  ;;  %1572 = vmatpush3.bf16.msra.mxu1 %v1571_v3 }
 0xcee   :  { %1573 = vmatprep.subr.bf16.mxu1 %v1790_v2 }
 0xd5f   :  { %v1017_v7 = vpop.permute.xlu1 %1016 }
 0xd60   :  { %v1019_v8 = vadd.f32 %v1017_v7, %v1013_v6 }
 0xd62   :  { %1690 = vtanh.f32 %v1019_v8 }
 0xd6c   :  { %v1691_v9 = vpop.eup %1690 }
 0xd6d   :  { %v1021_v10 = vmul.f32 %v1691_v9, %v1012_v4  ;;  %v1248_v4 = vld [vmem:[%s2241_s6 + $0x18] sm:$0xff] }
 0xd6e   :  { %v1574_v5 = vpack.c.bf16 %v1248_v4, %v1247_v60 }
 0xd6f   :  { %1023 = vrot.lane.b32.xlu0 %v1021_v10, %s1789_s15 }
 0xd70   :  { %1575 = vmatpush3.bf16.msra.mxu1 %v1574_v5 }
 0xde1   :  { %v1024_v12 = vpop.permute.xlu0 %1023 }
 0xde2   :  { %1394 = vmatmul.mubr.msk.f32.vlgmr.msra.gmra.mrb[8].mxu0 %vm255_vm1, %v1024_v12 }
 0xde3   :  { %1557 = vmatpush1.bf16.msra.mxu0 %v1892_v14  ;;  %1198 = vmatprep.mubr.f32.mxu0 %v1788_v0  ;;  %v220_v14 = vadd.f32 %v2037_v53, %v2053_v62  ;;  %v1404_v0 = vld [vmem:[%s2242_s7] ss:$0 sm:$0xff] }
 0xde4   :  { %1559 = vmatprep.subr.bf16.mxu0 %v1898_v16 }
 0xde7   :  { %1561 = vmatpush1.bf16.msra.mxu0 %v1921_v22 }
 0xde8   :  { %1563 = vmatprep.subr.bf16.mxu0 %v1924_v23 }
 0xdeb   :  { %1565 = vmatpush1.bf16.msra.mxu0 %v1949_v30 }
 0xdec   :  { %1567 = vmatprep.subr.bf16.mxu0 %v1952_v31 }
 0xdef   :  { %1569 = vmatpush1.bf16.msra.mxu0 %v1969_v35 }
 0xeb5   :  { %v1093_v13 = vpop.f32.mrb[8].mxu0 }
 0xeb6   :  { %v1094_v43 = vadd.f32 %v1093_v13, %v218_v42  ;;  %v1095_v15 = vpop.f32.mrb[9].mxu0 }
 0xeb7   :  { %v1096_v16 = vadd.f32 %v1095_v15, %v220_v14 }
 0xeb8   :  { %v1395_v22 = vmul.f32 -1.442695, %v1094_v43 }
 0xeb9   :  { %v1099_v17 = vmul.f32 2.0, %v1096_v16 }
 0xebb   :  { %v1101_v23 = vsel %vm250_vm2, %v1099_v17, %v1096_v16 }
 0xebc   :  { %v1396_v30 = vmul.f32 -1.442695, %v1101_v23 }
 0xebe   :  { %1692 = vpow2.f32 %v1396_v30 }
 0xebf   :  { %1694 = vpow2.f32 %v1395_v22 }
 0xec8   :  { %v1693_v31 = vpop.eup %1692 }
 0xec9   :  { %v1695_v35 = vpop.eup %1694  ;;  %v1109_v18 = vadd.f32 1.0, %v1693_v31 }
 0xeca   :  { %v1108_v52 = vadd.f32 1.0, %v1695_v35 }
 0xecb   :  { %1696 = vrcp.f32 %v1109_v18 }
 0xecc   :  { %1698 = vrcp.f32 %v1108_v52 }
 0xed5   :  { %v1697_v19 = vpop.eup %1696 }
 0xed6   :  { %v1115_v53 = vmul.f32 2.0, %v1697_v19  ;;  %v1699_v21 = vpop.eup %1698 }
 0xed7   :  { %v1120_v47 = vmul.f32 %v1699_v21, %v1019_v8 }
 0xed8   :  { %v1398_v20 = vadd.f32 -1.0, %v1115_v53 }
 0xeda   :  { %v1119_v46 = vsel %vm250_vm2, %v1398_v20, %v1697_v19 }
 0xedb   :  { %v1121_v24 = vmul.f32 %v1699_v21, %v1119_v46 }
 0xedd   :  { %1123 = vrot.lane.b32.xlu1 %v1121_v24, %s1789_s15 }
 0xf4f   :  { %v1124_v25 = vpop.permute.xlu1 %1123 }
 0xf50   :  { %v1126_v26 = vadd.f32 %v1124_v25, %v1120_v47 }
 0xf52   :  { %1700 = vtanh.f32 %v1126_v26 }
 0xf5c   :  { %v1701_v27 = vpop.eup %1700 }
 0xf5d   :  { %v1128_v29 = vmul.f32 %v1701_v27, %v1119_v46 }
 0xf5f   :  { %1130 = vrot.lane.b32.xlu0 %v1128_v29, %s1789_s15 }
 0xfd1   :  { %v1131_v32 = vpop.permute.xlu0 %1130 }
 0xfd2   :  { %1399 = vmatmul.mubr.msk.f32.vlgmr.msra.gmra.mrb[10].mxu0 %vm255_vm1, %v1131_v32 }
0x10a5   :  { %v1200_v36 = vpop.f32.mrb[10].mxu0 }
0x10a6   :  { %v1201_v37 = vadd.f32 %v1200_v36, %v224_v33  ;;  %v1202_v38 = vpop.f32.mrb[11].mxu0 }
0x10a7   :  { %v1203_v39 = vadd.f32 %v1202_v38, %v226_v34 }
0x10a8   :  { %v1400_v41 = vmul.f32 -1.442695, %v1201_v37 }
0x10a9   :  { %v1206_v40 = vmul.f32 2.0, %v1203_v39 }
0x10ab   :  { %v1208_v28 = vsel %vm250_vm2, %v1206_v40, %v1203_v39 }
0x10ac   :  { %v1401_v48 = vmul.f32 -1.442695, %v1208_v28 }
0x10ae   :  { %1702 = vpow2.f32 %v1401_v48 }
0x10af   :  { %1704 = vpow2.f32 %v1400_v41 }
0x10b8   :  { %v1703_v51 = vpop.eup %1702 }
0x10b9   :  { %v1705_v44 = vpop.eup %1704  ;;  %v1216_v55 = vadd.f32 1.0, %v1703_v51 }
0x10ba   :  { %v1215_v57 = vadd.f32 1.0, %v1705_v44 }
0x10bb   :  { %1706 = vrcp.f32 %v1216_v55 }
0x10bc   :  { %1708 = vrcp.f32 %v1215_v57 }
0x10c5   :  { %v1707_v61 = vpop.eup %1706 }
0x10c6   :  { %v1222_v59 = vmul.f32 2.0, %v1707_v61  ;;  %v1709_v45 = vpop.eup %1708 }
0x10c7   :  { %v1227_v11 = vmul.f32 %v1709_v45, %v1126_v26 }
0x10c8   :  { %v1403_v62 = vadd.f32 -1.0, %v1222_v59 }
0x10ca   :  { %v1226_v56 = vsel %vm250_vm2, %v1403_v62, %v1707_v61 }
0x10cb   :  { %v1228_v58 = vmul.f32 %v1709_v45, %v1226_v56 }
0x10cd   :  { %1230 = vrot.lane.b32.xlu1 %v1228_v58, %s1789_s15 }
0x113f   :  { %v1231_v63 = vpop.permute.xlu1 %1230 }
0x1140   :  { %v1233_v49 = vadd.f32 %v1231_v63, %v1227_v11 }
0x1142   :  { %1710 = vtanh.f32 %v1233_v49 }
0x114c   :  { %v1711_v6 = vpop.eup %1710 }
0x114d   :  { %v1235_v7 = vmul.f32 %v1711_v6, %v1226_v56 }
0x114f   :  { %1240 = vrot.lane.b32.xlu0 %v1235_v7, %s1789_s15  ;;  %s1756_s15 = scalar_lea.vmem %s1341_s22, 128 }
0x1150   :  { %p1757_p2 = scmp.ne.s32.totalorder %s1341_s22, %s1756_s15  ;;  %p1762_p4 = scmp.lt.s32.totalorder %s1756_s15, %s1756_s15 }
0x1152   :  { %p1763_p5 = por %p1762_p4, %p1761_p3 }
0x1154   :  { %p1764_p6 = pnand %p1763_p5, %p1757_p2 }
0x11c1   :  { %v1241_v8 = vpop.permute.xlu0 %1240 }
0x11c2   :  { %v1244_v9 = vsel %vm1238_vm7, %v1241_v8, %v1131_v32 }
0x11c3   :  { %1257 = vrot.lane.b32.xlu1 %v1244_v9, %s1792_s19 }
0x1235   :  { %v1258_v10 = vpop.permute.xlu1 %1257 }
0x1236   :  { %1420 = vmatmul.mubr.msk.f32.vlgmr.msra.gmra.mrb[18].mxu1 %vm1259_vm8, %v1258_v10 }
0x1309   :  { %v1328_v12 = vpop.f32.mrb[18].mxu1 }
0x130a   :  { %v1329_v42 = vadd.f32 %v1404_v0, %v1328_v12  ;;  %v1421_v14 = vpop.f32.mrb[19].mxu1 }
0x130c   :  { %1333 = vst.msk [vmem:[#allocation7] sm:$0xff] %vm1332_vm9, %v1329_v42 }
0x130d   :  { %1767 = shalt.err (!%p1764_p6)
}
0x130e   :  { %s1768_s24 = scalar_lea.hbm %s2243_s8, 128 }
0x130f   :  { %p1769_p7 = scmp.ne.s32.totalorder %s2243_s8, %s1768_s24  ;;  %p1772_p8 = scmp.lt.u32.totalorder %s1768_s24, %s2243_s8 }
0x1311   :  { %p1774_p9 = pnand %p1772_p8, %p1769_p7 }
0x1313   :  { %1777 = shalt.err (!%p1774_p9)
}
0x1314   :  { %1343 = dma.vmem_to_hbm [thread:$0]  %s1341_s22, 128, %s2243_s8, [#allocation4]  }
0x1315   :  { %1782 = dma.done.wait [#allocation4], 128  }
0x1316   :  { %1783 = vsyncadd [#allocation4], 4294967168 }
0x1317   :  { %1347 = vsyncpa [#allocation3], 1 }
0x1318   :  { %1348 = vsyncpa [#allocation6], 1 }
0x1319   :  { %1349 = vsyncpa [#allocation4], 1 }

</bundles_post_ra>
